<compile_context>
chip_gen: v7x
topology: tpu7x:2x2x1
jax: 0.10.0
libtpu: 0.0.40
codegen_flags: <defaults>
</compile_context>

<pallas_src>
import math
import functools

import jax
import jax.numpy as jnp
from jax import lax
from jax.experimental import pallas as pl
from jax.experimental.pallas import tpu as pltpu


# --------------------------------------------------------------------------
# Per-generation tuning (VMEM budget + tile targets)
# --------------------------------------------------------------------------

def _device_kind():
    try:
        return jax.devices()[0].device_kind.lower()
    except Exception:
        return ""


_KIND = _device_kind()
if ("v5" in _KIND) or ("v6" in _KIND):
    # v5e / v6e: 128 MiB physical VMEM -> big budget + big tiles.
    _VMEM_LIMIT = 100 * 1024 * 1024
    _TM, _TN, _TK = 512, 512, 1024
    _ATTN_TQ, _ATTN_TK = 512, 512
else:
    # v7x (64 MiB physical) or unknown -> conservative.
    _VMEM_LIMIT = 40 * 1024 * 1024
    _TM, _TN, _TK = 256, 256, 512
    _ATTN_TQ, _ATTN_TK = 256, 256


def _tile_pad(dim, target):
    """Pick a tile and the padded extent: full dim if small, else `target`."""
    if dim <= target:
        return dim, dim
    padded = -(-dim // target) * target
    return target, padded


# --------------------------------------------------------------------------
# Kernel: tiled linear  y = x @ w + b   (QKV / Q / KV projections, logits)
# --------------------------------------------------------------------------

def _linear_kernel(x_ref, w_ref, b_ref, o_ref, acc_ref):
    kk = pl.program_id(2)

    @pl.when(kk == 0)
    def _():
        acc_ref[...] = jnp.zeros_like(acc_ref)

    acc_ref[...] += jnp.dot(x_ref[...].astype(jnp.bfloat16),
                            w_ref[...].astype(jnp.bfloat16),
                            preferred_element_type=jnp.float32)

    @pl.when(kk == pl.num_programs(2) - 1)
    def _():
        o_ref[...] = (acc_ref[...] + b_ref[...]).astype(o_ref.dtype)


def linear(x, w, b, out_dtype=jnp.bfloat16):
    """x: (M, K), w: (K, N) bf16, b: (N,) f32 -> (M, N) out_dtype."""
    M, K = x.shape
    N = w.shape[1]
    tm, Mp = _tile_pad(M, _TM)
    tn, Np = _tile_pad(N, _TN)
    tk, Kp = _tile_pad(K, _TK)
    if (Mp, Kp) != (M, K):
        x = jnp.pad(x, ((0, Mp - M), (0, Kp - K)))
    if (Kp, Np) != (K, N):
        w = jnp.pad(w, ((0, Kp - K), (0, Np - N)))
    if Np != N:
        b = jnp.pad(b, (0, Np - N))
    cost = pl.CostEstimate(
        flops=2 * Mp * Np * Kp,
        transcendentals=0,
        bytes_accessed=int(Mp * Kp * x.dtype.itemsize + Kp * Np * 2
                           + Mp * Np * jnp.dtype(out_dtype).itemsize))
    out = pl.pallas_call(
        _linear_kernel,
        out_shape=jax.ShapeDtypeStruct((Mp, Np), out_dtype),
        grid=(Mp // tm, Np // tn, Kp // tk),
        in_specs=[pl.BlockSpec((tm, tk), lambda i, j, kk: (i, kk)),
                  pl.BlockSpec((tk, tn), lambda i, j, kk: (kk, j)),
                  pl.BlockSpec((1, tn), lambda i, j, kk: (0, j))],
        out_specs=pl.BlockSpec((tm, tn), lambda i, j, kk: (i, j)),
        scratch_shapes=[pltpu.VMEM((tm, tn), jnp.float32)],
        compiler_params=pltpu.CompilerParams(
            dimension_semantics=("parallel", "parallel", "arbitrary"),
            vmem_limit_bytes=_VMEM_LIMIT),
        cost_estimate=cost,
    )(x, w, b.reshape(1, Np))
    if (Mp, Np) != (M, N):
        out = out[:M, :N]
    return out


# --------------------------------------------------------------------------
# Kernel: flash-style multi-head attention
#   grid = (B, H, Sq tiles, Sk tiles), online softmax over the Sk axis.
# --------------------------------------------------------------------------

def _flash_attn_kernel(qvalid_ref, kvalid_ref, q_ref, k_ref, v_ref, o_ref,
                       m_ref, l_ref, acc_ref, *, scale, causal, tq, tk):
    ki = pl.program_id(3)

    @pl.when(ki == 0)
    def _():
        m_ref[...] = jnp.full(m_ref.shape, -jnp.inf, jnp.float32)
        l_ref[...] = jnp.zeros_like(l_ref)
        acc_ref[...] = jnp.zeros_like(acc_ref)

    q = q_ref[...].astype(jnp.bfloat16)                       # (tq, dk)
    k = k_ref[...].astype(jnp.bfloat16)                       # (tk, dk)
    # q @ k^T via last-dim contraction (no explicit transpose)
    s = lax.dot_general(q, k, (((1,), (1,)), ((), ())),
                        preferred_element_type=jnp.float32) * scale   # (tq, tk)

    kv_ok = kvalid_ref[...] > 0.5                             # (1, tk)
    if causal:
        qi = pl.program_id(2)
        row = qi * tq + lax.broadcasted_iota(jnp.int32, s.shape, 0)
        col = ki * tk + lax.broadcasted_iota(jnp.int32, s.shape, 1)
        q_ok = qvalid_ref[...] > 0.5                          # (tq, 1)
        ok = kv_ok & q_ok & (col <= row)
    else:
        ok = jnp.broadcast_to(kv_ok, s.shape)
    s = jnp.where(ok, s, jnp.float32(-1e9))                   # masked_fill semantics

    m_prev = m_ref[...]
    m_new = jnp.maximum(m_prev, jnp.max(s, axis=-1, keepdims=True))
    alpha = jnp.exp(m_prev - m_new)
    p = jnp.exp(s - m_new)
    l_ref[...] = alpha * l_ref[...] + jnp.sum(p, axis=-1, keepdims=True)
    acc_ref[...] = alpha * acc_ref[...] + jnp.dot(
        p.astype(jnp.bfloat16), v_ref[...].astype(jnp.bfloat16),
        preferred_element_type=jnp.float32)
    m_ref[...] = m_new

    @pl.when(ki == pl.num_programs(3) - 1)
    def _():
        o_ref[...] = (acc_ref[...] *
                      pl.reciprocal(l_ref[...], approx=True)).astype(o_ref.dtype)


def flash_attention(q, k, v, kvalid, qvalid, *, causal):
    """q: (B, H, Sq, dk), k/v: (B, H, Sk, dk) bf16;
       kvalid: (B, 1, Sk), qvalid: (B, Sq, 1) f32 {0,1}. -> (B, H, Sq, dk) bf16."""
    B, H, Sq, dk = q.shape
    Sk = k.shape[2]
    tq, Sqp = _tile_pad(Sq, _ATTN_TQ)
    tk, Skp = _tile_pad(Sk, _ATTN_TK)
    if Sqp != Sq:
        q = jnp.pad(q, ((0, 0), (0, 0), (0, Sqp - Sq), (0, 0)))
        qvalid = jnp.pad(qvalid, ((0, 0), (0, Sqp - Sq), (0, 0)))
    if Skp != Sk:
        k = jnp.pad(k, ((0, 0), (0, 0), (0, Skp - Sk), (0, 0)))
        v = jnp.pad(v, ((0, 0), (0, 0), (0, Skp - Sk), (0, 0)))
        kvalid = jnp.pad(kvalid, ((0, 0), (0, 0), (0, Skp - Sk)))

    kernel = functools.partial(_flash_attn_kernel, scale=1.0 / math.sqrt(dk),
                               causal=causal, tq=tq, tk=tk)
    cost = pl.CostEstimate(
        flops=4 * B * H * Sqp * Skp * dk,
        transcendentals=B * H * Sqp * Skp,
        bytes_accessed=int(2 * (B * H * Sqp * dk + 2 * B * H * Skp * dk
                                + B * H * Sqp * dk)))
    out = pl.pallas_call(
        kernel,
        out_shape=jax.ShapeDtypeStruct((B, H, Sqp, dk), jnp.bfloat16),
        grid=(B, H, Sqp // tq, Skp // tk),
        in_specs=[
            pl.BlockSpec((None, tq, 1), lambda b, h, qi, ki: (b, qi, 0)),
            pl.BlockSpec((None, 1, tk), lambda b, h, qi, ki: (b, 0, ki)),
            pl.BlockSpec((None, None, tq, dk), lambda b, h, qi, ki: (b, h, qi, 0)),
            pl.BlockSpec((None, None, tk, dk), lambda b, h, qi, ki: (b, h, ki, 0)),
            pl.BlockSpec((None, None, tk, dk), lambda b, h, qi, ki: (b, h, ki, 0)),
        ],
        out_specs=pl.BlockSpec((None, None, tq, dk),
                               lambda b, h, qi, ki: (b, h, qi, 0)),
        scratch_shapes=[pltpu.VMEM((tq, 1), jnp.float32),
                        pltpu.VMEM((tq, 1), jnp.float32),
                        pltpu.VMEM((tq, dk), jnp.float32)],
        compiler_params=pltpu.CompilerParams(
            dimension_semantics=("parallel", "parallel", "parallel", "arbitrary"),
            vmem_limit_bytes=_VMEM_LIMIT),
        cost_estimate=cost,
    )(qvalid, kvalid, q, k, v)
    if Sqp != Sq:
        out = out[:, :, :Sq, :]
    return out


# --------------------------------------------------------------------------
# Kernel: out-projection + residual + LayerNorm fused
# --------------------------------------------------------------------------

def _proj_add_ln_kernel(x_ref, w_ref, b_ref, r_ref, g_ref, bb_ref, o_ref, acc_ref):
    kk = pl.program_id(1)

    @pl.when(kk == 0)
    def _():
        acc_ref[...] = jnp.zeros_like(acc_ref)

    acc_ref[...] += jnp.dot(x_ref[...].astype(jnp.bfloat16),
                            w_ref[...].astype(jnp.bfloat16),
                            preferred_element_type=jnp.float32)

    @pl.when(kk == pl.num_programs(1) - 1)
    def _():
        y = acc_ref[...] + b_ref[...] + r_ref[...]
        mean = jnp.mean(y, axis=-1, keepdims=True)
        var = jnp.mean(jnp.square(y - mean), axis=-1, keepdims=True)
        o_ref[...] = ((y - mean) * lax.rsqrt(var + 1e-5) * g_ref[...]
                      + bb_ref[...]).astype(o_ref.dtype)


def proj_residual_ln(x, w, b, res, gamma, beta):
    """LayerNorm(res + (x @ w + b)).  x: (M, K) bf16, res: (M, D) f32."""
    M, K = x.shape
    D = w.shape[1]
    tm, Mp = _tile_pad(M, _TM)
    tk, Kp = _tile_pad(K, _TK)
    if (Mp, Kp) != (M, K):
        x = jnp.pad(x, ((0, Mp - M), (0, Kp - K)))
    if Kp != K:
        w = jnp.pad(w, ((0, Kp - K), (0, 0)))
    if Mp != M:
        res = jnp.pad(res, ((0, Mp - M), (0, 0)))
    out = pl.pallas_call(
        _proj_add_ln_kernel,
        out_shape=jax.ShapeDtypeStruct((Mp, D), jnp.float32),
        grid=(Mp // tm, Kp // tk),
        in_specs=[pl.BlockSpec((tm, tk), lambda i, kk: (i, kk)),
                  pl.BlockSpec((tk, D), lambda i, kk: (kk, 0)),
                  pl.BlockSpec((1, D), lambda i, kk: (0, 0)),
                  pl.BlockSpec((tm, D), lambda i, kk: (i, 0)),
                  pl.BlockSpec((1, D), lambda i, kk: (0, 0)),
                  pl.BlockSpec((1, D), lambda i, kk: (0, 0))],
        out_specs=pl.BlockSpec((tm, D), lambda i, kk: (i, 0)),
        scratch_shapes=[pltpu.VMEM((tm, D), jnp.float32)],
        compiler_params=pltpu.CompilerParams(
            dimension_semantics=("parallel", "arbitrary"),
            vmem_limit_bytes=_VMEM_LIMIT),
    )(x, w, b.reshape(1, D), res, gamma.reshape(1, D), beta.reshape(1, D))
    return out[:M] if Mp != M else out


# --------------------------------------------------------------------------
# Kernel: FFN (fc2(relu(fc1(x)))) + residual + LayerNorm fused,
#         with d_ff as a tiled reduction axis.  Residual == x (reused, no
#         second stream from HBM).
# --------------------------------------------------------------------------

def _ffn_ln_kernel(x_ref, w1_ref, b1_ref, w2_ref, b2_ref, g_ref, bb_ref,
                   o_ref, acc_ref):
    f = pl.program_id(1)

    @pl.when(f == 0)
    def _():
        acc_ref[...] = jnp.zeros_like(acc_ref)

    h = jnp.dot(x_ref[...].astype(jnp.bfloat16), w1_ref[...].astype(jnp.bfloat16),
                preferred_element_type=jnp.float32) + b1_ref[...]
    h = jnp.maximum(h, 0.0)
    acc_ref[...] += jnp.dot(h.astype(jnp.bfloat16), w2_ref[...].astype(jnp.bfloat16),
                            preferred_element_type=jnp.float32)

    @pl.when(f == pl.num_programs(1) - 1)
    def _():
        y = acc_ref[...] + b2_ref[...] + x_ref[...]
        mean = jnp.mean(y, axis=-1, keepdims=True)
        var = jnp.mean(jnp.square(y - mean), axis=-1, keepdims=True)
        o_ref[...] = ((y - mean) * lax.rsqrt(var + 1e-5) * g_ref[...]
                      + bb_ref[...]).astype(o_ref.dtype)


def ffn_residual_ln(x, w1, b1, w2, b2, gamma, beta):
    """LayerNorm(x + fc2(relu(fc1(x)))).  x: (M, D) f32."""
    M, D = x.shape
    Dff = w1.shape[1]
    tm, Mp = _tile_pad(M, _TM)
    tff, Dffp = _tile_pad(Dff, _TK)
    if Mp != M:
        x = jnp.pad(x, ((0, Mp - M), (0, 0)))
    if Dffp != Dff:
        w1 = jnp.pad(w1, ((0, 0), (0, Dffp - Dff)))
        b1 = jnp.pad(b1, (0, Dffp - Dff))
        w2 = jnp.pad(w2, ((0, Dffp - Dff), (0, 0)))
    out = pl.pallas_call(
        _ffn_ln_kernel,
        out_shape=jax.ShapeDtypeStruct((Mp, D), jnp.float32),
        grid=(Mp // tm, Dffp // tff),
        in_specs=[pl.BlockSpec((tm, D), lambda i, f: (i, 0)),
                  pl.BlockSpec((D, tff), lambda i, f: (0, f)),
                  pl.BlockSpec((1, tff), lambda i, f: (0, f)),
                  pl.BlockSpec((tff, D), lambda i, f: (f, 0)),
                  pl.BlockSpec((1, D), lambda i, f: (0, 0)),
                  pl.BlockSpec((1, D), lambda i, f: (0, 0)),
                  pl.BlockSpec((1, D), lambda i, f: (0, 0))],
        out_specs=pl.BlockSpec((tm, D), lambda i, f: (i, 0)),
        scratch_shapes=[pltpu.VMEM((tm, D), jnp.float32)],
        compiler_params=pltpu.CompilerParams(
            dimension_semantics=("parallel", "arbitrary"),
            vmem_limit_bytes=_VMEM_LIMIT),
    )(x, w1, b1.reshape(1, Dffp), w2, b2.reshape(1, D),
      gamma.reshape(1, D), beta.reshape(1, D))
    return out[:M] if Mp != M else out


# --------------------------------------------------------------------------
# Model composition (embedding / PE / head transposes in plain JAX)
# --------------------------------------------------------------------------

def mha_self(x, p, kvalid, qvalid, causal, num_heads):
    B, S, D = x.shape
    dk = D // num_heads
    qkv = linear(x.reshape(B * S, D), p['wqkv'], p['bqkv'],
                 out_dtype=jnp.bfloat16)                          # (B*S, 3D)
    qkv = qkv.reshape(B, S, 3, num_heads, dk).transpose(2, 0, 3, 1, 4)
    q, k, v = qkv[0], qkv[1], qkv[2]                              # (B, H, S, dk)
    o = flash_attention(q, k, v, kvalid, qvalid, causal=causal)
    return o.transpose(0, 2, 1, 3).reshape(B * S, D)              # bf16


def mha_cross(x, enc, p, kvalid, qvalid, num_heads):
    B, Sq, D = x.shape
    Sk = enc.shape[1]
    dk = D // num_heads
    q = linear(x.reshape(B * Sq, D), p['wq'], p['bq'], out_dtype=jnp.bfloat16)
    q = q.reshape(B, Sq, num_heads, dk).transpose(0, 2, 1, 3)
    kv = linear(enc.reshape(B * Sk, D), p['wkv'], p['bkv'], out_dtype=jnp.bfloat16)
    kv = kv.reshape(B, Sk, 2, num_heads, dk).transpose(2, 0, 3, 1, 4)
    k, v = kv[0], kv[1]
    o = flash_attention(q, k, v, kvalid, qvalid, causal=False)
    return o.transpose(0, 2, 1, 3).reshape(B * Sq, D)


def encoder_layer(x, p, src_kvalid, dummy_qvalid, num_heads):
    B, S, D = x.shape
    xf = x.reshape(B * S, D)
    a = mha_self(x, p['attn'], src_kvalid, dummy_qvalid, False, num_heads)
    x2 = proj_residual_ln(a, p['attn']['wo'], p['attn']['bo'], xf,
                          p['ln1_g'], p['ln1_b'])
    x3 = ffn_residual_ln(x2, p['w1'], p['b1'], p['w2'], p['b2'],
                         p['ln2_g'], p['ln2_b'])
    return x3.reshape(B, S, D)


def decoder_layer(x, enc, p, src_kvalid, tgt_kvalid_ones, tgt_qvalid,
                  dummy_qvalid, num_heads):
    B, S, D = x.shape
    xf = x.reshape(B * S, D)
    a = mha_self(x, p['self_attn'], tgt_kvalid_ones, tgt_qvalid, True, num_heads)
    x2 = proj_residual_ln(a, p['self_attn']['wo'], p['self_attn']['bo'], xf,
                          p['ln1_g'], p['ln1_b'])
    a = mha_cross(x2.reshape(B, S, D), enc, p['cross_attn'], src_kvalid,
                  dummy_qvalid, num_heads)
    x3 = proj_residual_ln(a, p['cross_attn']['wo'], p['cross_attn']['bo'], x2,
                          p['ln2_g'], p['ln2_b'])
    x4 = ffn_residual_ln(x3, p['w1'], p['b1'], p['w2'], p['b2'],
                         p['ln3_g'], p['ln3_b'])
    return x4.reshape(B, S, D)


def positional_encoding(d_model, max_len):
    position = jnp.arange(max_len, dtype=jnp.float32)[:, None]
    div_term = jnp.exp(jnp.arange(0, d_model, 2, dtype=jnp.float32)
                       * (-math.log(10000.0) / d_model))
    pe = jnp.zeros((max_len, d_model), jnp.float32)
    pe = pe.at[:, 0::2].set(jnp.sin(position * div_term))
    pe = pe.at[:, 1::2].set(jnp.cos(position * div_term))
    return pe


def transformer_forward(params, src, tgt, *, num_heads, num_layers):
    B, Ss = src.shape
    St = tgt.shape[1]
    # Per-position validity vectors (no dense (B, S, S) bias in HBM).
    src_kvalid = (src != 0).astype(jnp.float32).reshape(B, 1, Ss)   # key mask
    tgt_qvalid = (tgt != 0).astype(jnp.float32).reshape(B, St, 1)   # query mask
    tgt_kvalid_ones = jnp.ones((B, 1, St), jnp.float32)
    dummy_q_src = jnp.ones((B, Ss, 1), jnp.float32)
    dummy_q_tgt = jnp.ones((B, St, 1), jnp.float32)

    pe = params['pe']
    # TODO(synk): dropout layers are identity (eval-mode semantics).
    x = params['enc_emb'][src] + pe[None, :Ss]
    for l in range(num_layers):
        x = encoder_layer(x, params['enc_layers'][l], src_kvalid, dummy_q_src,
                          num_heads)
    enc_out = x

    y = params['dec_emb'][tgt] + pe[None, :St]
    for l in range(num_layers):
        y = decoder_layer(y, enc_out, params['dec_layers'][l], src_kvalid,
                          tgt_kvalid_ones, tgt_qvalid, dummy_q_tgt, num_heads)

    D = y.shape[-1]
    logits = linear(y.reshape(B * St, D), params['fc_w'], params['fc_b'],
                    out_dtype=jnp.float32)
    return logits.reshape(B, St, -1)


# --------------------------------------------------------------------------
# Deterministic parameter init (weights bf16 for the MXU; everything else f32)
# --------------------------------------------------------------------------

def _init_linear(key, d_in, d_out):
    kw, kb = jax.random.split(key)
    bound = 1.0 / math.sqrt(d_in)
    w = jax.random.uniform(kw, (d_in, d_out), jnp.float32, -bound, bound)
    b = jax.random.uniform(kb, (d_out,), jnp.float32, -bound, bound)
    return w, b


def _init_self_attn(key, d_model):
    kq, kk, kv, ko = jax.random.split(key, 4)
    wq, bq = _init_linear(kq, d_model, d_model)
    wk, bk = _init_linear(kk, d_model, d_model)
    wv, bv = _init_linear(kv, d_model, d_model)
    wo, bo = _init_linear(ko, d_model, d_model)
    return {'wqkv': jnp.concatenate([wq, wk, wv], axis=1).astype(jnp.bfloat16),
            'bqkv': jnp.concatenate([bq, bk, bv], axis=0),
            'wo': wo.astype(jnp.bfloat16), 'bo': bo}


def _init_cross_attn(key, d_model):
    kq, kk, kv, ko = jax.random.split(key, 4)
    wq, bq = _init_linear(kq, d_model, d_model)
    wk, bk = _init_linear(kk, d_model, d_model)
    wv, bv = _init_linear(kv, d_model, d_model)
    wo, bo = _init_linear(ko, d_model, d_model)
    return {'wq': wq.astype(jnp.bfloat16), 'bq': bq,
            'wkv': jnp.concatenate([wk, wv], axis=1).astype(jnp.bfloat16),
            'bkv': jnp.concatenate([bk, bv], axis=0),
            'wo': wo.astype(jnp.bfloat16), 'bo': bo}


def _init_ffn(k1, k2, d_model, d_ff):
    w1, b1 = _init_linear(k1, d_model, d_ff)
    w2, b2 = _init_linear(k2, d_ff, d_model)
    return {'w1': w1.astype(jnp.bfloat16), 'b1': b1,
            'w2': w2.astype(jnp.bfloat16), 'b2': b2}


def _init_enc_layer(key, d_model, d_ff):
    k1, k2, k3 = jax.random.split(key, 3)
    p = {'attn': _init_self_attn(k1, d_model),
         'ln1_g': jnp.ones((d_model,), jnp.float32),
         'ln1_b': jnp.zeros((d_model,), jnp.float32),
         'ln2_g': jnp.ones((d_model,), jnp.float32),
         'ln2_b': jnp.zeros((d_model,), jnp.float32)}
    p.update(_init_ffn(k2, k3, d_model, d_ff))
    return p


def _init_dec_layer(key, d_model, d_ff):
    k1, k2, k3, k4 = jax.random.split(key, 4)
    p = {'self_attn': _init_self_attn(k1, d_model),
         'cross_attn': _init_cross_attn(k2, d_model),
         'ln1_g': jnp.ones((d_model,), jnp.float32),
         'ln1_b': jnp.zeros((d_model,), jnp.float32),
         'ln2_g': jnp.ones((d_model,), jnp.float32),
         'ln2_b': jnp.zeros((d_model,), jnp.float32),
         'ln3_g': jnp.ones((d_model,), jnp.float32),
         'ln3_b': jnp.zeros((d_model,), jnp.float32)}
    p.update(_init_ffn(k3, k4, d_model, d_ff))
    return p


def init_params(key, src_vocab, tgt_vocab, d_model, num_layers, d_ff, max_seq):
    ks = jax.random.split(key, 4 + 2 * num_layers)
    fc_w, fc_b = _init_linear(ks[2], d_model, tgt_vocab)
    return {
        'enc_emb': jax.random.normal(ks[0], (src_vocab, d_model), jnp.float32),
        'dec_emb': jax.random.normal(ks[1], (tgt_vocab, d_model), jnp.float32),
        'fc_w': fc_w.astype(jnp.bfloat16), 'fc_b': fc_b,
        'pe': positional_encoding(d_model, max_seq),
        'enc_layers': [_init_enc_layer(ks[4 + i], d_model, d_ff)
                       for i in range(num_layers)],
        'dec_layers': [_init_dec_layer(ks[4 + num_layers + i], d_model, d_ff)
                       for i in range(num_layers)],
    }


# --------------------------------------------------------------------------

if __name__ == "__main__":
    src_vocab, tgt_vocab = 24, 24
    d_model, num_heads, num_layers, d_ff = 32, 4, 2, 64
    max_seq, B, S = 16, 2, 8

    key = jax.random.PRNGKey(0)
    kp, ks, kt = jax.random.split(key, 3)
    params = init_params(kp, src_vocab, tgt_vocab, d_model,
                         num_layers, d_ff, max_seq)
    # tokens in [1, vocab) so there are no padded positions
    src = jax.random.randint(ks, (B, S), 1, src_vocab, dtype=jnp.int32)
    tgt = jax.random.randint(kt, (B, S), 1, tgt_vocab, dtype=jnp.int32)

    fwd = jax.jit(functools.partial(transformer_forward,
                                    num_heads=num_heads,
                                    num_layers=num_layers))
    out = fwd(params, src, tgt)
    jax.block_until_ready(out)
    assert out.shape == (B, S, tgt_vocab) and out.dtype == jnp.float32
    assert bool(jnp.all(jnp.isfinite(out)))
    print("KERNEL_OK")
</pallas_src>

<mosaic_0001>
module attributes {stable_mosaic.version = 11 : i64} {
  func.func @_linear_kernel(%arg0: i32, %arg1: i32, %arg2: i32, %arg3: memref<16x32xf32, #tpu.memory_space<vmem>>, %arg4: memref<32x96xbf16, #tpu.memory_space<vmem>>, %arg5: memref<1x96xf32, #tpu.memory_space<vmem>>, %arg6: memref<16x96xbf16, #tpu.memory_space<vmem>>, %arg7: memref<16x96xf32, #tpu.memory_space<vmem>>) attributes {dimension_semantics = [#tpu.dimension_semantics<parallel>, #tpu.dimension_semantics<parallel>, #tpu.dimension_semantics<arbitrary>], iteration_bounds = array<i64: 1, 1, 1>, scalar_prefetch = 0 : i64, scratch_operands = 1 : i64, tpu.core_type = #tpu.core_type<tc>, window_params = [{transform_indices = @transform_0, window_bounds = array<i64: 16, 32>}, {transform_indices = @transform_1, window_bounds = array<i64: 32, 96>}, {transform_indices = @transform_2, window_bounds = array<i64: 1, 96>}, {transform_indices = @transform_3, window_bounds = array<i64: 16, 96>}]} {
    %c0_i32 = arith.constant 0 : i32
    %0 = arith.cmpi eq, %arg2, %c0_i32 : i32
    %1 = arith.extui %0 : i1 to i32
    %c0_i32_0 = arith.constant 0 : i32
    %2 = arith.cmpi ne, %1, %c0_i32_0 : i32
    scf.if %2 {
      %cst_10 = arith.constant 0.000000e+00 : f32
      %13 = vector.broadcast %cst_10 : f32 to vector<16x96xf32>
      %c0_11 = arith.constant 0 : index
      %c0_12 = arith.constant 0 : index
      %14 = vector.load %arg7[%c0_11, %c0_12] : memref<16x96xf32, #tpu.memory_space<vmem>>, vector<16x96xf32>
      tpu.vector_store %arg7[%c0_11, %c0_12], %13 {strides = array<i32>} : memref<16x96xf32, #tpu.memory_space<vmem>>, vector<16x96xf32>,
    } else {
    }
    %c0 = arith.constant 0 : index
    %c0_1 = arith.constant 0 : index
    %3 = vector.load %arg7[%c0, %c0_1] : memref<16x96xf32, #tpu.memory_space<vmem>>, vector<16x96xf32>
    %c0_2 = arith.constant 0 : index
    %c0_3 = arith.constant 0 : index
    %4 = vector.load %arg3[%c0_2, %c0_3] : memref<16x32xf32, #tpu.memory_space<vmem>>, vector<16x32xf32>
    %5 = arith.truncf %4 : vector<16x32xf32> to vector<16x32xbf16>
    %c0_4 = arith.constant 0 : index
    %c0_5 = arith.constant 0 : index
    %6 = vector.load %arg4[%c0_4, %c0_5] : memref<32x96xbf16, #tpu.memory_space<vmem>>, vector<32x96xbf16>
    %cst = arith.constant dense<0.000000e+00> : vector<16x96xf32>
    %7 = tpu.matmul %5, %6, %cst {dimension_numbers = #tpu.dot_dimension_numbers<[1], [0], [0], [1], [0, 0, 1, 1], [], []>} : vector<16x32xbf16>, vector<32x96xbf16>, vector<16x96xf32> -> vector<16x96xf32>
    %8 = arith.addf %3, %7 : vector<16x96xf32>
    %c0_6 = arith.constant 0 : index
    %c0_7 = arith.constant 0 : index
    %9 = vector.load %arg7[%c0_6, %c0_7] : memref<16x96xf32, #tpu.memory_space<vmem>>, vector<16x96xf32>
    tpu.vector_store %arg7[%c0_6, %c0_7], %8 {strides = array<i32>} : memref<16x96xf32, #tpu.memory_space<vmem>>, vector<16x96xf32>,
    %c0_i32_8 = arith.constant 0 : i32
    %10 = arith.cmpi eq, %arg2, %c0_i32_8 : i32
    %11 = arith.extui %10 : i1 to i32
    %c0_i32_9 = arith.constant 0 : i32
    %12 = arith.cmpi ne, %11, %c0_i32_9 : i32
    scf.if %12 {
      %c0_10 = arith.constant 0 : index
      %c0_11 = arith.constant 0 : index
      %13 = vector.load %arg7[%c0_10, %c0_11] : memref<16x96xf32, #tpu.memory_space<vmem>>, vector<16x96xf32>
      %c0_12 = arith.constant 0 : index
      %c0_13 = arith.constant 0 : index
      %14 = vector.load %arg5[%c0_12, %c0_13] : memref<1x96xf32, #tpu.memory_space<vmem>>, vector<1x96xf32>
      %15 = vector.broadcast %14 : vector<1x96xf32> to vector<16x96xf32>
      %16 = arith.addf %13, %15 : vector<16x96xf32>
      %17 = arith.truncf %16 : vector<16x96xf32> to vector<16x96xbf16>
      %c0_14 = arith.constant 0 : index
      %c0_15 = arith.constant 0 : index
      %18 = vector.load %arg6[%c0_14, %c0_15] : memref<16x96xbf16, #tpu.memory_space<vmem>>, vector<16x96xbf16>
      tpu.vector_store %arg6[%c0_14, %c0_15], %17 {strides = array<i32>} : memref<16x96xbf16, #tpu.memory_space<vmem>>, vector<16x96xbf16>,
    } else {
    }
    return
  }
  func.func @transform_0(%arg0: i32, %arg1: i32, %arg2: i32) -> (i32, i32) {
    %c0_i32 = arith.constant 0 : i32
    return %arg0, %arg2 : i32, i32
  }
  func.func @transform_1(%arg0: i32, %arg1: i32, %arg2: i32) -> (i32, i32) {
    %c0_i32 = arith.constant 0 : i32
    return %arg2, %arg1 : i32, i32
  }
  func.func @transform_2(%arg0: i32, %arg1: i32, %arg2: i32) -> (i32, i32) {
    %c0_i32 = arith.constant 0 : i32
    %c0_i32_0 = arith.constant 0 : i32
    return %c0_i32, %arg1 : i32, i32
  }
  func.func @transform_3(%arg0: i32, %arg1: i32, %arg2: i32) -> (i32, i32) {
    %c0_i32 = arith.constant 0 : i32
    return %arg0, %arg1 : i32, i32
  }
}

module attributes {stable_mosaic.version = 11 : i64} {
  func.func @_flash_attn_kernel(%arg0: i32, %arg1: i32, %arg2: i32, %arg3: i32, %arg4: memref<1x8x1xf32, #tpu.memory_space<vmem>>, %arg5: memref<1x1x8xf32, #tpu.memory_space<vmem>>, %arg6: memref<1x1x8x8xbf16, #tpu.memory_space<vmem>>, %arg7: memref<1x1x8x8xbf16, #tpu.memory_space<vmem>>, %arg8: memref<1x1x8x8xbf16, #tpu.memory_space<vmem>>, %arg9: memref<1x1x8x8xbf16, #tpu.memory_space<vmem>>, %arg10: memref<8x1xf32, #tpu.memory_space<vmem>>, %arg11: memref<8x1xf32, #tpu.memory_space<vmem>>, %arg12: memref<8x8xf32, #tpu.memory_space<vmem>>) attributes {dimension_semantics = [#tpu.dimension_semantics<parallel>, #tpu.dimension_semantics<parallel>, #tpu.dimension_semantics<parallel>, #tpu.dimension_semantics<arbitrary>], iteration_bounds = array<i64: 2, 4, 1, 1>, scalar_prefetch = 0 : i64, scratch_operands = 3 : i64, tpu.core_type = #tpu.core_type<tc>, window_params = [{transform_indices = @transform_0, window_bounds = array<i64: 1, 8, 1>}, {transform_indices = @transform_1, window_bounds = array<i64: 1, 1, 8>}, {transform_indices = @transform_2, window_bounds = array<i64: 1, 1, 8, 8>}, {transform_indices = @transform_3, window_bounds = array<i64: 1, 1, 8, 8>}, {transform_indices = @transform_4, window_bounds = array<i64: 1, 1, 8, 8>}, {transform_indices = @transform_5, window_bounds = array<i64: 1, 1, 8, 8>}]} {
    %c0_i32 = arith.constant 0 : i32
    %0 = arith.cmpi eq, %arg3, %c0_i32 : i32
    %1 = arith.extui %0 : i1 to i32
    %c0_i32_0 = arith.constant 0 : i32
    %2 = arith.cmpi ne, %1, %c0_i32_0 : i32
    scf.if %2 {
      %cst_40 = arith.constant 0xFF800000 : f32
      %61 = vector.broadcast %cst_40 : f32 to vector<8x1xf32>
      %c0_41 = arith.constant 0 : index
      %c0_42 = arith.constant 0 : index
      %62 = vector.load %arg10[%c0_41, %c0_42] : memref<8x1xf32, #tpu.memory_space<vmem>>, vector<8x1xf32>
      tpu.vector_store %arg10[%c0_41, %c0_42], %61 {strides = array<i32>} : memref<8x1xf32, #tpu.memory_space<vmem>>, vector<8x1xf32>,
      %cst_43 = arith.constant 0.000000e+00 : f32
      %63 = vector.broadcast %cst_43 : f32 to vector<8x1xf32>
      %c0_44 = arith.constant 0 : index
      %c0_45 = arith.constant 0 : index
      %64 = vector.load %arg11[%c0_44, %c0_45] : memref<8x1xf32, #tpu.memory_space<vmem>>, vector<8x1xf32>
      tpu.vector_store %arg11[%c0_44, %c0_45], %63 {strides = array<i32>} : memref<8x1xf32, #tpu.memory_space<vmem>>, vector<8x1xf32>,
      %cst_46 = arith.constant 0.000000e+00 : f32
      %65 = vector.broadcast %cst_46 : f32 to vector<8x8xf32>
      %c0_47 = arith.constant 0 : index
      %c0_48 = arith.constant 0 : index
      %66 = vector.load %arg12[%c0_47, %c0_48] : memref<8x8xf32, #tpu.memory_space<vmem>>, vector<8x8xf32>
      tpu.vector_store %arg12[%c0_47, %c0_48], %65 {strides = array<i32>} : memref<8x8xf32, #tpu.memory_space<vmem>>, vector<8x8xf32>,
    } else {
    }
    %c0 = arith.constant 0 : index
    %c0_1 = arith.constant 0 : index
    %c0_2 = arith.constant 0 : index
    %c0_3 = arith.constant 0 : index
    %3 = vector.load %arg6[%c0, %c0_1, %c0_2, %c0_3] : memref<1x1x8x8xbf16, #tpu.memory_space<vmem>>, vector<1x1x8x8xbf16>
    %4 = vector.shape_cast %3 : vector<1x1x8x8xbf16> to vector<8x8xbf16>
    %c0_4 = arith.constant 0 : index
    %c0_5 = arith.constant 0 : index
    %c0_6 = arith.constant 0 : index
    %c0_7 = arith.constant 0 : index
    %5 = vector.load %arg7[%c0_4, %c0_5, %c0_6, %c0_7] : memref<1x1x8x8xbf16, #tpu.memory_space<vmem>>, vector<1x1x8x8xbf16>
    %6 = vector.shape_cast %5 : vector<1x1x8x8xbf16> to vector<8x8xbf16>
    %cst = arith.constant dense<0.000000e+00> : vector<8x8xf32>
    %7 = tpu.matmul %4, %6, %cst {dimension_numbers = #tpu.dot_dimension_numbers<[1], [1], [0], [0], [0, 0, 1, 0], [], []>} : vector<8x8xbf16>, vector<8x8xbf16>, vector<8x8xf32> -> vector<8x8xf32>
    %cst_8 = arith.constant 0.353553385 : f32
    %8 = vector.broadcast %cst_8 : f32 to vector<8x8xf32>
    %9 = arith.mulf %7, %8 : vector<8x8xf32>
    %c0_9 = arith.constant 0 : index
    %c0_10 = arith.constant 0 : index
    %c0_11 = arith.constant 0 : index
    %10 = vector.load %arg5[%c0_9, %c0_10, %c0_11] : memref<1x1x8xf32, #tpu.memory_space<vmem>>, vector<1x1x8xf32>
    %11 = vector.shape_cast %10 : vector<1x1x8xf32> to vector<1x8xf32>
    %cst_12 = arith.constant 5.000000e-01 : f32
    %12 = vector.broadcast %cst_12 : f32 to vector<1x8xf32>
    %13 = arith.cmpf ogt, %11, %12 : vector<1x8xf32>
    %c8_i32 = arith.constant 8 : i32
    %14 = arith.muli %arg2, %c8_i32 : i32
    %15 = tpu.iota {dimensions = array<i32: 0>} : vector<8x8xi32>
    %16 = vector.broadcast %14 : i32 to vector<8x8xi32>
    %17 = arith.addi %16, %15 : vector<8x8xi32>
    %c8_i32_13 = arith.constant 8 : i32
    %18 = arith.muli %arg3, %c8_i32_13 : i32
    %19 = tpu.iota {dimensions = array<i32: 1>} : vector<8x8xi32>
    %20 = vector.broadcast %18 : i32 to vector<8x8xi32>
    %21 = arith.addi %20, %19 : vector<8x8xi32>
    %c0_14 = arith.constant 0 : index
    %c0_15 = arith.constant 0 : index
    %c0_16 = arith.constant 0 : index
    %22 = vector.load %arg4[%c0_14, %c0_15, %c0_16] : memref<1x8x1xf32, #tpu.memory_space<vmem>>, vector<1x8x1xf32>
    %23 = vector.shape_cast %22 : vector<1x8x1xf32> to vector<8x1xf32>
    %cst_17 = arith.constant 5.000000e-01 : f32
    %24 = vector.broadcast %cst_17 : f32 to vector<8x1xf32>
    %25 = arith.cmpf ogt, %23, %24 : vector<8x1xf32>
    %26 = vector.broadcast %13 : vector<1x8xi1> to vector<8x8xi1>
    %27 = vector.broadcast %25 : vector<8x1xi1> to vector<8x8xi1>
    %28 = arith.andi %26, %27 : vector<8x8xi1>
    %29 = arith.cmpi sle, %21, %17 : vector<8x8xi32>
    %30 = arith.andi %28, %29 : vector<8x8xi1>
    %cst_18 = arith.constant -1.000000e+09 : f32
    %31 = vector.broadcast %cst_18 : f32 to vector<8x8xf32>
    %32 = arith.select %30, %9, %31 : vector<8x8xi1>, vector<8x8xf32>
    %c0_19 = arith.constant 0 : index
    %c0_20 = arith.constant 0 : index
    %33 = vector.load %arg10[%c0_19, %c0_20] : memref<8x1xf32, #tpu.memory_space<vmem>>, vector<8x1xf32>
    %cst_21 = arith.constant dense<0xFF800000> : vector<8xf32>
    %34 = vector.multi_reduction <maximumf>, %32, %cst_21 [1] : vector<8x8xf32> to vector<8xf32>
    %35 = vector.shape_cast %34 : vector<8xf32> to vector<8x1xf32>
    %36 = arith.maximumf %33, %35 : vector<8x1xf32>
    %37 = arith.subf %33, %36 : vector<8x1xf32>
    %38 = math.exp %37 : vector<8x1xf32>
    %39 = vector.broadcast %36 : vector<8x1xf32> to vector<8x8xf32>
    %40 = arith.subf %32, %39 : vector<8x8xf32>
    %41 = math.exp %40 : vector<8x8xf32>
    %c0_22 = arith.constant 0 : index
    %c0_23 = arith.constant 0 : index
    %42 = vector.load %arg11[%c0_22, %c0_23] : memref<8x1xf32, #tpu.memory_space<vmem>>, vector<8x1xf32>
    %43 = arith.mulf %38, %42 : vector<8x1xf32>
    %cst_24 = arith.constant dense<0.000000e+00> : vector<8xf32>
    %44 = vector.multi_reduction <add>, %41, %cst_24 [1] : vector<8x8xf32> to vector<8xf32>
    %45 = vector.shape_cast %44 : vector<8xf32> to vector<8x1xf32>
    %46 = arith.addf %43, %45 : vector<8x1xf32>
    %c0_25 = arith.constant 0 : index
    %c0_26 = arith.constant 0 : index
    %47 = vector.load %arg11[%c0_25, %c0_26] : memref<8x1xf32, #tpu.memory_space<vmem>>, vector<8x1xf32>
    tpu.vector_store %arg11[%c0_25, %c0_26], %46 {strides = array<i32>} : memref<8x1xf32, #tpu.memory_space<vmem>>, vector<8x1xf32>,
    %c0_27 = arith.constant 0 : index
    %c0_28 = arith.constant 0 : index
    %48 = vector.load %arg12[%c0_27, %c0_28] : memref<8x8xf32, #tpu.memory_space<vmem>>, vector<8x8xf32>
    %49 = vector.broadcast %38 : vector<8x1xf32> to vector<8x8xf32>
    %50 = arith.mulf %49, %48 : vector<8x8xf32>
    %51 = arith.truncf %41 : vector<8x8xf32> to vector<8x8xbf16>
    %c0_29 = arith.constant 0 : index
    %c0_30 = arith.constant 0 : index
    %c0_31 = arith.constant 0 : index
    %c0_32 = arith.constant 0 : index
    %52 = vector.load %arg8[%c0_29, %c0_30, %c0_31, %c0_32] : memref<1x1x8x8xbf16, #tpu.memory_space<vmem>>, vector<1x1x8x8xbf16>
    %53 = vector.shape_cast %52 : vector<1x1x8x8xbf16> to vector<8x8xbf16>
    %cst_33 = arith.constant dense<0.000000e+00> : vector<8x8xf32>
    %54 = tpu.matmul %51, %53, %cst_33 {dimension_numbers = #tpu.dot_dimension_numbers<[1], [0], [0], [1], [0, 0, 1, 1], [], []>} : vector<8x8xbf16>, vector<8x8xbf16>, vector<8x8xf32> -> vector<8x8xf32>
    %55 = arith.addf %50, %54 : vector<8x8xf32>
    %c0_34 = arith.constant 0 : index
    %c0_35 = arith.constant 0 : index
    %56 = vector.load %arg12[%c0_34, %c0_35] : memref<8x8xf32, #tpu.memory_space<vmem>>, vector<8x8xf32>
    tpu.vector_store %arg12[%c0_34, %c0_35], %55 {strides = array<i32>} : memref<8x8xf32, #tpu.memory_space<vmem>>, vector<8x8xf32>,
    %c0_36 = arith.constant 0 : index
    %c0_37 = arith.constant 0 : index
    %57 = vector.load %arg10[%c0_36, %c0_37] : memref<8x1xf32, #tpu.memory_space<vmem>>, vector<8x1xf32>
    tpu.vector_store %arg10[%c0_36, %c0_37], %36 {strides = array<i32>} : memref<8x1xf32, #tpu.memory_space<vmem>>, vector<8x1xf32>,
    %c0_i32_38 = arith.constant 0 : i32
    %58 = arith.cmpi eq, %arg3, %c0_i32_38 : i32
    %59 = arith.extui %58 : i1 to i32
    %c0_i32_39 = arith.constant 0 : i32
    %60 = arith.cmpi ne, %59, %c0_i32_39 : i32
    scf.if %60 {
      %c0_40 = arith.constant 0 : index
      %c0_41 = arith.constant 0 : index
      %61 = vector.load %arg12[%c0_40, %c0_41] : memref<8x8xf32, #tpu.memory_space<vmem>>, vector<8x8xf32>
      %c0_42 = arith.constant 0 : index
      %c0_43 = arith.constant 0 : index
      %62 = vector.load %arg11[%c0_42, %c0_43] : memref<8x1xf32, #tpu.memory_space<vmem>>, vector<8x1xf32>
      %63 = tpu.reciprocal %62 {approx = true} : vector<8x1xf32> -> vector<8x1xf32>
      %64 = vector.broadcast %63 : vector<8x1xf32> to vector<8x8xf32>
      %65 = arith.mulf %61, %64 : vector<8x8xf32>
      %66 = arith.truncf %65 : vector<8x8xf32> to vector<8x8xbf16>
      %c0_44 = arith.constant 0 : index
      %c0_45 = arith.constant 0 : index
      %c0_46 = arith.constant 0 : index
      %c0_47 = arith.constant 0 : index
      %67 = vector.load %arg9[%c0_44, %c0_45, %c0_46, %c0_47] : memref<1x1x8x8xbf16, #tpu.memory_space<vmem>>, vector<1x1x8x8xbf16>
      %68 = vector.shape_cast %67 : vector<1x1x8x8xbf16> to vector<8x8xbf16>
      %69 = vector.shape_cast %66 : vector<8x8xbf16> to vector<1x1x8x8xbf16>
      tpu.vector_store %arg9[%c0_44, %c0_45, %c0_46, %c0_47], %69 {strides = array<i32>} : memref<1x1x8x8xbf16, #tpu.memory_space<vmem>>, vector<1x1x8x8xbf16>,
    } else {
    }
    return
  }
  func.func @transform_0(%arg0: i32, %arg1: i32, %arg2: i32, %arg3: i32) -> (i32, i32, i32) {
    %c0_i32 = arith.constant 0 : i32
    %c0_i32_0 = arith.constant 0 : i32
    return %arg0, %arg2, %c0_i32 : i32, i32, i32
  }
  func.func @transform_1(%arg0: i32, %arg1: i32, %arg2: i32, %arg3: i32) -> (i32, i32, i32) {
    %c0_i32 = arith.constant 0 : i32
    %c0_i32_0 = arith.constant 0 : i32
    return %arg0, %c0_i32, %arg3 : i32, i32, i32
  }
  func.func @transform_2(%arg0: i32, %arg1: i32, %arg2: i32, %arg3: i32) -> (i32, i32, i32, i32) {
    %c0_i32 = arith.constant 0 : i32
    %c0_i32_0 = arith.constant 0 : i32
    return %arg0, %arg1, %arg2, %c0_i32 : i32, i32, i32, i32
  }
  func.func @transform_3(%arg0: i32, %arg1: i32, %arg2: i32, %arg3: i32) -> (i32, i32, i32, i32) {
    %c0_i32 = arith.constant 0 : i32
    %c0_i32_0 = arith.constant 0 : i32
    return %arg0, %arg1, %arg3, %c0_i32 : i32, i32, i32, i32
  }
  func.func @transform_4(%arg0: i32, %arg1: i32, %arg2: i32, %arg3: i32) -> (i32, i32, i32, i32) {
    %c0_i32 = arith.constant 0 : i32
    %c0_i32_0 = arith.constant 0 : i32
    return %arg0, %arg1, %arg3, %c0_i32 : i32, i32, i32, i32
  }
  func.func @transform_5(%arg0: i32, %arg1: i32, %arg2: i32, %arg3: i32) -> (i32, i32, i32, i32) {
    %c0_i32 = arith.constant 0 : i32
    %c0_i32_0 = arith.constant 0 : i32
    return %arg0, %arg1, %arg2, %c0_i32 : i32, i32, i32, i32
  }
}

module attributes {stable_mosaic.version = 11 : i64} {
  func.func @_proj_add_ln_kernel(%arg0: i32, %arg1: i32, %arg2: memref<16x32xbf16, #tpu.memory_space<vmem>>, %arg3: memref<32x32xbf16, #tpu.memory_space<vmem>>, %arg4: memref<1x32xf32, #tpu.memory_space<vmem>>, %arg5: memref<16x32xf32, #tpu.memory_space<vmem>>, %arg6: memref<1x32xf32, #tpu.memory_space<vmem>>, %arg7: memref<1x32xf32, #tpu.memory_space<vmem>>, %arg8: memref<16x32xf32, #tpu.memory_space<vmem>>, %arg9: memref<16x32xf32, #tpu.memory_space<vmem>>) attributes {dimension_semantics = [#tpu.dimension_semantics<parallel>, #tpu.dimension_semantics<arbitrary>], iteration_bounds = array<i64: 1, 1>, scalar_prefetch = 0 : i64, scratch_operands = 1 : i64, tpu.core_type = #tpu.core_type<tc>, window_params = [{transform_indices = @transform_0, window_bounds = array<i64: 16, 32>}, {transform_indices = @transform_1, window_bounds = array<i64: 32, 32>}, {pipeline_mode = #tpu.pipeline_mode<synchronous>, transform_indices = @transform_2, window_bounds = array<i64: 1, 32>}, {transform_indices = @transform_3, window_bounds = array<i64: 16, 32>}, {pipeline_mode = #tpu.pipeline_mode<synchronous>, transform_indices = @transform_4, window_bounds = array<i64: 1, 32>}, {pipeline_mode = #tpu.pipeline_mode<synchronous>, transform_indices = @transform_5, window_bounds = array<i64: 1, 32>}, {transform_indices = @transform_6, window_bounds = array<i64: 16, 32>}]} {
    %c0_i32 = arith.constant 0 : i32
    %0 = arith.cmpi eq, %arg1, %c0_i32 : i32
    %1 = arith.extui %0 : i1 to i32
    %c0_i32_0 = arith.constant 0 : i32
    %2 = arith.cmpi ne, %1, %c0_i32_0 : i32
    scf.if %2 {
      %cst_10 = arith.constant 0.000000e+00 : f32
      %12 = vector.broadcast %cst_10 : f32 to vector<16x32xf32>
      %c0_11 = arith.constant 0 : index
      %c0_12 = arith.constant 0 : index
      %13 = vector.load %arg9[%c0_11, %c0_12] : memref<16x32xf32, #tpu.memory_space<vmem>>, vector<16x32xf32>
      tpu.vector_store %arg9[%c0_11, %c0_12], %12 {strides = array<i32>} : memref<16x32xf32, #tpu.memory_space<vmem>>, vector<16x32xf32>,
    } else {
    }
    %c0 = arith.constant 0 : index
    %c0_1 = arith.constant 0 : index
    %3 = vector.load %arg9[%c0, %c0_1] : memref<16x32xf32, #tpu.memory_space<vmem>>, vector<16x32xf32>
    %c0_2 = arith.constant 0 : index
    %c0_3 = arith.constant 0 : index
    %4 = vector.load %arg2[%c0_2, %c0_3] : memref<16x32xbf16, #tpu.memory_space<vmem>>, vector<16x32xbf16>
    %c0_4 = arith.constant 0 : index
    %c0_5 = arith.constant 0 : index
    %5 = vector.load %arg3[%c0_4, %c0_5] : memref<32x32xbf16, #tpu.memory_space<vmem>>, vector<32x32xbf16>
    %cst = arith.constant dense<0.000000e+00> : vector<16x32xf32>
    %6 = tpu.matmul %4, %5, %cst {dimension_numbers = #tpu.dot_dimension_numbers<[1], [0], [0], [1], [0, 0, 1, 1], [], []>} : vector<16x32xbf16>, vector<32x32xbf16>, vector<16x32xf32> -> vector<16x32xf32>
    %7 = arith.addf %3, %6 : vector<16x32xf32>
    %c0_6 = arith.constant 0 : index
    %c0_7 = arith.constant 0 : index
    %8 = vector.load %arg9[%c0_6, %c0_7] : memref<16x32xf32, #tpu.memory_space<vmem>>, vector<16x32xf32>
    tpu.vector_store %arg9[%c0_6, %c0_7], %7 {strides = array<i32>} : memref<16x32xf32, #tpu.memory_space<vmem>>, vector<16x32xf32>,
    %c0_i32_8 = arith.constant 0 : i32
    %9 = arith.cmpi eq, %arg1, %c0_i32_8 : i32
    %10 = arith.extui %9 : i1 to i32
    %c0_i32_9 = arith.constant 0 : i32
    %11 = arith.cmpi ne, %10, %c0_i32_9 : i32
    scf.if %11 {
      %c0_10 = arith.constant 0 : index
      %c0_11 = arith.constant 0 : index
      %12 = vector.load %arg9[%c0_10, %c0_11] : memref<16x32xf32, #tpu.memory_space<vmem>>, vector<16x32xf32>
      %c0_12 = arith.constant 0 : index
      %c0_13 = arith.constant 0 : index
      %13 = vector.load %arg4[%c0_12, %c0_13] : memref<1x32xf32, #tpu.memory_space<vmem>>, vector<1x32xf32>
      %14 = vector.broadcast %13 : vector<1x32xf32> to vector<16x32xf32>
      %15 = arith.addf %12, %14 : vector<16x32xf32>
      %c0_14 = arith.constant 0 : index
      %c0_15 = arith.constant 0 : index
      %16 = vector.load %arg5[%c0_14, %c0_15] : memref<16x32xf32, #tpu.memory_space<vmem>>, vector<16x32xf32>
      %17 = arith.addf %15, %16 : vector<16x32xf32>
      %cst_16 = arith.constant dense<0.000000e+00> : vector<16xf32>
      %18 = vector.multi_reduction <add>, %17, %cst_16 [1] : vector<16x32xf32> to vector<16xf32>
      %19 = vector.shape_cast %18 : vector<16xf32> to vector<16x1xf32>
      %cst_17 = arith.constant 3.200000e+01 : f32
      %20 = vector.broadcast %cst_17 : f32 to vector<16x1xf32>
      %21 = arith.divf %19, %20 : vector<16x1xf32>
      %22 = vector.broadcast %21 : vector<16x1xf32> to vector<16x32xf32>
      %23 = arith.subf %17, %22 : vector<16x32xf32>
      %24 = arith.mulf %23, %23 : vector<16x32xf32>
      %cst_18 = arith.constant dense<0.000000e+00> : vector<16xf32>
      %25 = vector.multi_reduction <add>, %24, %cst_18 [1] : vector<16x32xf32> to vector<16xf32>
      %26 = vector.shape_cast %25 : vector<16xf32> to vector<16x1xf32>
      %cst_19 = arith.constant 3.200000e+01 : f32
      %27 = vector.broadcast %cst_19 : f32 to vector<16x1xf32>
      %28 = arith.divf %26, %27 : vector<16x1xf32>
      %29 = vector.broadcast %21 : vector<16x1xf32> to vector<16x32xf32>
      %30 = arith.subf %17, %29 : vector<16x32xf32>
      %cst_20 = arith.constant 9.99999974E-6 : f32
      %31 = vector.broadcast %cst_20 : f32 to vector<16x1xf32>
      %32 = arith.addf %28, %31 : vector<16x1xf32>
      %33 = math.rsqrt %32 : vector<16x1xf32>
      %34 = vector.broadcast %33 : vector<16x1xf32> to vector<16x32xf32>
      %35 = arith.mulf %30, %34 : vector<16x32xf32>
      %c0_21 = arith.constant 0 : index
      %c0_22 = arith.constant 0 : index
      %36 = vector.load %arg6[%c0_21, %c0_22] : memref<1x32xf32, #tpu.memory_space<vmem>>, vector<1x32xf32>
      %37 = vector.broadcast %36 : vector<1x32xf32> to vector<16x32xf32>
      %38 = arith.mulf %35, %37 : vector<16x32xf32>
      %c0_23 = arith.constant 0 : index
      %c0_24 = arith.constant 0 : index
      %39 = vector.load %arg7[%c0_23, %c0_24] : memref<1x32xf32, #tpu.memory_space<vmem>>, vector<1x32xf32>
      %40 = vector.broadcast %39 : vector<1x32xf32> to vector<16x32xf32>
      %41 = arith.addf %38, %40 : vector<16x32xf32>
      %c0_25 = arith.constant 0 : index
      %c0_26 = arith.constant 0 : index
      %42 = vector.load %arg8[%c0_25, %c0_26] : memref<16x32xf32, #tpu.memory_space<vmem>>, vector<16x32xf32>
      tpu.vector_store %arg8[%c0_25, %c0_26], %41 {strides = array<i32>} : memref<16x32xf32, #tpu.memory_space<vmem>>, vector<16x32xf32>,
    } else {
    }
    return
  }
  func.func @transform_0(%arg0: i32, %arg1: i32) -> (i32, i32) {
    %c0_i32 = arith.constant 0 : i32
    return %arg0, %arg1 : i32, i32
  }
  func.func @transform_1(%arg0: i32, %arg1: i32) -> (i32, i32) {
    %c0_i32 = arith.constant 0 : i32
    %c0_i32_0 = arith.constant 0 : i32
    return %arg1, %c0_i32 : i32, i32
  }
  func.func @transform_2(%arg0: i32, %arg1: i32) -> (i32, i32) {
    %c0_i32 = arith.constant 0 : i32
    %c0_i32_0 = arith.constant 0 : i32
    %c0_i32_1 = arith.constant 0 : i32
    return %c0_i32, %c0_i32_0 : i32, i32
  }
  func.func @transform_3(%arg0: i32, %arg1: i32) -> (i32, i32) {
    %c0_i32 = arith.constant 0 : i32
    %c0_i32_0 = arith.constant 0 : i32
    return %arg0, %c0_i32 : i32, i32
  }
  func.func @transform_4(%arg0: i32, %arg1: i32) -> (i32, i32) {
    %c0_i32 = arith.constant 0 : i32
    %c0_i32_0 = arith.constant 0 : i32
    %c0_i32_1 = arith.constant 0 : i32
    return %c0_i32, %c0_i32_0 : i32, i32
  }
  func.func @transform_5(%arg0: i32, %arg1: i32) -> (i32, i32) {
    %c0_i32 = arith.constant 0 : i32
    %c0_i32_0 = arith.constant 0 : i32
    %c0_i32_1 = arith.constant 0 : i32
    return %c0_i32, %c0_i32_0 : i32, i32
  }
  func.func @transform_6(%arg0: i32, %arg1: i32) -> (i32, i32) {
    %c0_i32 = arith.constant 0 : i32
    %c0_i32_0 = arith.constant 0 : i32
    return %arg0, %c0_i32 : i32, i32
  }
}

module attributes {stable_mosaic.version = 11 : i64} {
  func.func @_linear_kernel(%arg0: i32, %arg1: i32, %arg2: i32, %arg3: memref<16x32xf32, #tpu.memory_space<vmem>>, %arg4: memref<32x32xbf16, #tpu.memory_space<vmem>>, %arg5: memref<1x32xf32, #tpu.memory_space<vmem>>, %arg6: memref<16x32xbf16, #tpu.memory_space<vmem>>, %arg7: memref<16x32xf32, #tpu.memory_space<vmem>>) attributes {dimension_semantics = [#tpu.dimension_semantics<parallel>, #tpu.dimension_semantics<parallel>, #tpu.dimension_semantics<arbitrary>], iteration_bounds = array<i64: 1, 1, 1>, scalar_prefetch = 0 : i64, scratch_operands = 1 : i64, tpu.core_type = #tpu.core_type<tc>, window_params = [{transform_indices = @transform_0, window_bounds = array<i64: 16, 32>}, {transform_indices = @transform_1, window_bounds = array<i64: 32, 32>}, {transform_indices = @transform_2, window_bounds = array<i64: 1, 32>}, {transform_indices = @transform_3, window_bounds = array<i64: 16, 32>}]} {
    %c0_i32 = arith.constant 0 : i32
    %0 = arith.cmpi eq, %arg2, %c0_i32 : i32
    %1 = arith.extui %0 : i1 to i32
    %c0_i32_0 = arith.constant 0 : i32
    %2 = arith.cmpi ne, %1, %c0_i32_0 : i32
    scf.if %2 {
      %cst_10 = arith.constant 0.000000e+00 : f32
      %13 = vector.broadcast %cst_10 : f32 to vector<16x32xf32>
      %c0_11 = arith.constant 0 : index
      %c0_12 = arith.constant 0 : index
      %14 = vector.load %arg7[%c0_11, %c0_12] : memref<16x32xf32, #tpu.memory_space<vmem>>, vector<16x32xf32>
      tpu.vector_store %arg7[%c0_11, %c0_12], %13 {strides = array<i32>} : memref<16x32xf32, #tpu.memory_space<vmem>>, vector<16x32xf32>,
    } else {
    }
    %c0 = arith.constant 0 : index
    %c0_1 = arith.constant 0 : index
    %3 = vector.load %arg7[%c0, %c0_1] : memref<16x32xf32, #tpu.memory_space<vmem>>, vector<16x32xf32>
    %c0_2 = arith.constant 0 : index
    %c0_3 = arith.constant 0 : index
    %4 = vector.load %arg3[%c0_2, %c0_3] : memref<16x32xf32, #tpu.memory_space<vmem>>, vector<16x32xf32>
    %5 = arith.truncf %4 : vector<16x32xf32> to vector<16x32xbf16>
    %c0_4 = arith.constant 0 : index
    %c0_5 = arith.constant 0 : index
    %6 = vector.load %arg4[%c0_4, %c0_5] : memref<32x32xbf16, #tpu.memory_space<vmem>>, vector<32x32xbf16>
    %cst = arith.constant dense<0.000000e+00> : vector<16x32xf32>
    %7 = tpu.matmul %5, %6, %cst {dimension_numbers = #tpu.dot_dimension_numbers<[1], [0], [0], [1], [0, 0, 1, 1], [], []>} : vector<16x32xbf16>, vector<32x32xbf16>, vector<16x32xf32> -> vector<16x32xf32>
    %8 = arith.addf %3, %7 : vector<16x32xf32>
    %c0_6 = arith.constant 0 : index
    %c0_7 = arith.constant 0 : index
    %9 = vector.load %arg7[%c0_6, %c0_7] : memref<16x32xf32, #tpu.memory_space<vmem>>, vector<16x32xf32>
    tpu.vector_store %arg7[%c0_6, %c0_7], %8 {strides = array<i32>} : memref<16x32xf32, #tpu.memory_space<vmem>>, vector<16x32xf32>,
    %c0_i32_8 = arith.constant 0 : i32
    %10 = arith.cmpi eq, %arg2, %c0_i32_8 : i32
    %11 = arith.extui %10 : i1 to i32
    %c0_i32_9 = arith.constant 0 : i32
    %12 = arith.cmpi ne, %11, %c0_i32_9 : i32
    scf.if %12 {
      %c0_10 = arith.constant 0 : index
      %c0_11 = arith.constant 0 : index
      %13 = vector.load %arg7[%c0_10, %c0_11] : memref<16x32xf32, #tpu.memory_space<vmem>>, vector<16x32xf32>
      %c0_12 = arith.constant 0 : index
      %c0_13 = arith.constant 0 : index
      %14 = vector.load %arg5[%c0_12, %c0_13] : memref<1x32xf32, #tpu.memory_space<vmem>>, vector<1x32xf32>
      %15 = vector.broadcast %14 : vector<1x32xf32> to vector<16x32xf32>
      %16 = arith.addf %13, %15 : vector<16x32xf32>
      %17 = arith.truncf %16 : vector<16x32xf32> to vector<16x32xbf16>
      %c0_14 = arith.constant 0 : index
      %c0_15 = arith.constant 0 : index
      %18 = vector.load %arg6[%c0_14, %c0_15] : memref<16x32xbf16, #tpu.memory_space<vmem>>, vector<16x32xbf16>
      tpu.vector_store %arg6[%c0_14, %c0_15], %17 {strides = array<i32>} : memref<16x32xbf16, #tpu.memory_space<vmem>>, vector<16x32xbf16>,
    } else {
    }
    return
  }
  func.func @transform_0(%arg0: i32, %arg1: i32, %arg2: i32) -> (i32, i32) {
    %c0_i32 = arith.constant 0 : i32
    return %arg0, %arg2 : i32, i32
  }
  func.func @transform_1(%arg0: i32, %arg1: i32, %arg2: i32) -> (i32, i32) {
    %c0_i32 = arith.constant 0 : i32
    return %arg2, %arg1 : i32, i32
  }
  func.func @transform_2(%arg0: i32, %arg1: i32, %arg2: i32) -> (i32, i32) {
    %c0_i32 = arith.constant 0 : i32
    %c0_i32_0 = arith.constant 0 : i32
    return %c0_i32, %arg1 : i32, i32
  }
  func.func @transform_3(%arg0: i32, %arg1: i32, %arg2: i32) -> (i32, i32) {
    %c0_i32 = arith.constant 0 : i32
    return %arg0, %arg1 : i32, i32
  }
}

module attributes {stable_mosaic.version = 11 : i64} {
  func.func @_flash_attn_kernel(%arg0: i32, %arg1: i32, %arg2: i32, %arg3: i32, %arg4: memref<1x8x1xf32, #tpu.memory_space<vmem>>, %arg5: memref<1x1x8xf32, #tpu.memory_space<vmem>>, %arg6: memref<1x1x8x8xbf16, #tpu.memory_space<vmem>>, %arg7: memref<1x1x8x8xbf16, #tpu.memory_space<vmem>>, %arg8: memref<1x1x8x8xbf16, #tpu.memory_space<vmem>>, %arg9: memref<1x1x8x8xbf16, #tpu.memory_space<vmem>>, %arg10: memref<8x1xf32, #tpu.memory_space<vmem>>, %arg11: memref<8x1xf32, #tpu.memory_space<vmem>>, %arg12: memref<8x8xf32, #tpu.memory_space<vmem>>) attributes {dimension_semantics = [#tpu.dimension_semantics<parallel>, #tpu.dimension_semantics<parallel>, #tpu.dimension_semantics<parallel>, #tpu.dimension_semantics<arbitrary>], iteration_bounds = array<i64: 2, 4, 1, 1>, scalar_prefetch = 0 : i64, scratch_operands = 3 : i64, tpu.core_type = #tpu.core_type<tc>, window_params = [{transform_indices = @transform_0, window_bounds = array<i64: 1, 8, 1>}, {transform_indices = @transform_1, window_bounds = array<i64: 1, 1, 8>}, {transform_indices = @transform_2, window_bounds = array<i64: 1, 1, 8, 8>}, {transform_indices = @transform_3, window_bounds = array<i64: 1, 1, 8, 8>}, {transform_indices = @transform_4, window_bounds = array<i64: 1, 1, 8, 8>}, {transform_indices = @transform_5, window_bounds = array<i64: 1, 1, 8, 8>}]} {
    %c0_i32 = arith.constant 0 : i32
    %0 = arith.cmpi eq, %arg3, %c0_i32 : i32
    %1 = arith.extui %0 : i1 to i32
    %c0_i32_0 = arith.constant 0 : i32
    %2 = arith.cmpi ne, %1, %c0_i32_0 : i32
    scf.if %2 {
      %cst_35 = arith.constant 0xFF800000 : f32
      %46 = vector.broadcast %cst_35 : f32 to vector<8x1xf32>
      %c0_36 = arith.constant 0 : index
      %c0_37 = arith.constant 0 : index
      %47 = vector.load %arg10[%c0_36, %c0_37] : memref<8x1xf32, #tpu.memory_space<vmem>>, vector<8x1xf32>
      tpu.vector_store %arg10[%c0_36, %c0_37], %46 {strides = array<i32>} : memref<8x1xf32, #tpu.memory_space<vmem>>, vector<8x1xf32>,
      %cst_38 = arith.constant 0.000000e+00 : f32
      %48 = vector.broadcast %cst_38 : f32 to vector<8x1xf32>
      %c0_39 = arith.constant 0 : index
      %c0_40 = arith.constant 0 : index
      %49 = vector.load %arg11[%c0_39, %c0_40] : memref<8x1xf32, #tpu.memory_space<vmem>>, vector<8x1xf32>
      tpu.vector_store %arg11[%c0_39, %c0_40], %48 {strides = array<i32>} : memref<8x1xf32, #tpu.memory_space<vmem>>, vector<8x1xf32>,
      %cst_41 = arith.constant 0.000000e+00 : f32
      %50 = vector.broadcast %cst_41 : f32 to vector<8x8xf32>
      %c0_42 = arith.constant 0 : index
      %c0_43 = arith.constant 0 : index
      %51 = vector.load %arg12[%c0_42, %c0_43] : memref<8x8xf32, #tpu.memory_space<vmem>>, vector<8x8xf32>
      tpu.vector_store %arg12[%c0_42, %c0_43], %50 {strides = array<i32>} : memref<8x8xf32, #tpu.memory_space<vmem>>, vector<8x8xf32>,
    } else {
    }
    %c0 = arith.constant 0 : index
    %c0_1 = arith.constant 0 : index
    %c0_2 = arith.constant 0 : index
    %c0_3 = arith.constant 0 : index
    %3 = vector.load %arg6[%c0, %c0_1, %c0_2, %c0_3] : memref<1x1x8x8xbf16, #tpu.memory_space<vmem>>, vector<1x1x8x8xbf16>
    %4 = vector.shape_cast %3 : vector<1x1x8x8xbf16> to vector<8x8xbf16>
    %c0_4 = arith.constant 0 : index
    %c0_5 = arith.constant 0 : index
    %c0_6 = arith.constant 0 : index
    %c0_7 = arith.constant 0 : index
    %5 = vector.load %arg7[%c0_4, %c0_5, %c0_6, %c0_7] : memref<1x1x8x8xbf16, #tpu.memory_space<vmem>>, vector<1x1x8x8xbf16>
    %6 = vector.shape_cast %5 : vector<1x1x8x8xbf16> to vector<8x8xbf16>
    %cst = arith.constant dense<0.000000e+00> : vector<8x8xf32>
    %7 = tpu.matmul %4, %6, %cst {dimension_numbers = #tpu.dot_dimension_numbers<[1], [1], [0], [0], [0, 0, 1, 0], [], []>} : vector<8x8xbf16>, vector<8x8xbf16>, vector<8x8xf32> -> vector<8x8xf32>
    %cst_8 = arith.constant 0.353553385 : f32
    %8 = vector.broadcast %cst_8 : f32 to vector<8x8xf32>
    %9 = arith.mulf %7, %8 : vector<8x8xf32>
    %c0_9 = arith.constant 0 : index
    %c0_10 = arith.constant 0 : index
    %c0_11 = arith.constant 0 : index
    %10 = vector.load %arg5[%c0_9, %c0_10, %c0_11] : memref<1x1x8xf32, #tpu.memory_space<vmem>>, vector<1x1x8xf32>
    %11 = vector.shape_cast %10 : vector<1x1x8xf32> to vector<1x8xf32>
    %cst_12 = arith.constant 5.000000e-01 : f32
    %12 = vector.broadcast %cst_12 : f32 to vector<1x8xf32>
    %13 = arith.cmpf ogt, %11, %12 : vector<1x8xf32>
    %14 = vector.shape_cast %13 : vector<1x8xi1> to vector<1x8xi1>
    %15 = vector.broadcast %14 : vector<1x8xi1> to vector<8x8xi1>
    %cst_13 = arith.constant -1.000000e+09 : f32
    %16 = vector.broadcast %cst_13 : f32 to vector<8x8xf32>
    %17 = arith.select %15, %9, %16 : vector<8x8xi1>, vector<8x8xf32>
    %c0_14 = arith.constant 0 : index
    %c0_15 = arith.constant 0 : index
    %18 = vector.load %arg10[%c0_14, %c0_15] : memref<8x1xf32, #tpu.memory_space<vmem>>, vector<8x1xf32>
    %cst_16 = arith.constant dense<0xFF800000> : vector<8xf32>
    %19 = vector.multi_reduction <maximumf>, %17, %cst_16 [1] : vector<8x8xf32> to vector<8xf32>
    %20 = vector.shape_cast %19 : vector<8xf32> to vector<8x1xf32>
    %21 = arith.maximumf %18, %20 : vector<8x1xf32>
    %22 = arith.subf %18, %21 : vector<8x1xf32>
    %23 = math.exp %22 : vector<8x1xf32>
    %24 = vector.broadcast %21 : vector<8x1xf32> to vector<8x8xf32>
    %25 = arith.subf %17, %24 : vector<8x8xf32>
    %26 = math.exp %25 : vector<8x8xf32>
    %c0_17 = arith.constant 0 : index
    %c0_18 = arith.constant 0 : index
    %27 = vector.load %arg11[%c0_17, %c0_18] : memref<8x1xf32, #tpu.memory_space<vmem>>, vector<8x1xf32>
    %28 = arith.mulf %23, %27 : vector<8x1xf32>
    %cst_19 = arith.constant dense<0.000000e+00> : vector<8xf32>
    %29 = vector.multi_reduction <add>, %26, %cst_19 [1] : vector<8x8xf32> to vector<8xf32>
    %30 = vector.shape_cast %29 : vector<8xf32> to vector<8x1xf32>
    %31 = arith.addf %28, %30 : vector<8x1xf32>
    %c0_20 = arith.constant 0 : index
    %c0_21 = arith.constant 0 : index
    %32 = vector.load %arg11[%c0_20, %c0_21] : memref<8x1xf32, #tpu.memory_space<vmem>>, vector<8x1xf32>
    tpu.vector_store %arg11[%c0_20, %c0_21], %31 {strides = array<i32>} : memref<8x1xf32, #tpu.memory_space<vmem>>, vector<8x1xf32>,
    %c0_22 = arith.constant 0 : index
    %c0_23 = arith.constant 0 : index
    %33 = vector.load %arg12[%c0_22, %c0_23] : memref<8x8xf32, #tpu.memory_space<vmem>>, vector<8x8xf32>
    %34 = vector.broadcast %23 : vector<8x1xf32> to vector<8x8xf32>
    %35 = arith.mulf %34, %33 : vector<8x8xf32>
    %36 = arith.truncf %26 : vector<8x8xf32> to vector<8x8xbf16>
    %c0_24 = arith.constant 0 : index
    %c0_25 = arith.constant 0 : index
    %c0_26 = arith.constant 0 : index
    %c0_27 = arith.constant 0 : index
    %37 = vector.load %arg8[%c0_24, %c0_25, %c0_26, %c0_27] : memref<1x1x8x8xbf16, #tpu.memory_space<vmem>>, vector<1x1x8x8xbf16>
    %38 = vector.shape_cast %37 : vector<1x1x8x8xbf16> to vector<8x8xbf16>
    %cst_28 = arith.constant dense<0.000000e+00> : vector<8x8xf32>
    %39 = tpu.matmul %36, %38, %cst_28 {dimension_numbers = #tpu.dot_dimension_numbers<[1], [0], [0], [1], [0, 0, 1, 1], [], []>} : vector<8x8xbf16>, vector<8x8xbf16>, vector<8x8xf32> -> vector<8x8xf32>
    %40 = arith.addf %35, %39 : vector<8x8xf32>
    %c0_29 = arith.constant 0 : index
    %c0_30 = arith.constant 0 : index
    %41 = vector.load %arg12[%c0_29, %c0_30] : memref<8x8xf32, #tpu.memory_space<vmem>>, vector<8x8xf32>
    tpu.vector_store %arg12[%c0_29, %c0_30], %40 {strides = array<i32>} : memref<8x8xf32, #tpu.memory_space<vmem>>, vector<8x8xf32>,
    %c0_31 = arith.constant 0 : index
    %c0_32 = arith.constant 0 : index
    %42 = vector.load %arg10[%c0_31, %c0_32] : memref<8x1xf32, #tpu.memory_space<vmem>>, vector<8x1xf32>
    tpu.vector_store %arg10[%c0_31, %c0_32], %21 {strides = array<i32>} : memref<8x1xf32, #tpu.memory_space<vmem>>, vector<8x1xf32>,
    %c0_i32_33 = arith.constant 0 : i32
    %43 = arith.cmpi eq, %arg3, %c0_i32_33 : i32
    %44 = arith.extui %43 : i1 to i32
    %c0_i32_34 = arith.constant 0 : i32
    %45 = arith.cmpi ne, %44, %c0_i32_34 : i32
    scf.if %45 {
      %c0_35 = arith.constant 0 : index
      %c0_36 = arith.constant 0 : index
      %46 = vector.load %arg12[%c0_35, %c0_36] : memref<8x8xf32, #tpu.memory_space<vmem>>, vector<8x8xf32>
      %c0_37 = arith.constant 0 : index
      %c0_38 = arith.constant 0 : index
      %47 = vector.load %arg11[%c0_37, %c0_38] : memref<8x1xf32, #tpu.memory_space<vmem>>, vector<8x1xf32>
      %48 = tpu.reciprocal %47 {approx = true} : vector<8x1xf32> -> vector<8x1xf32>
      %49 = vector.broadcast %48 : vector<8x1xf32> to vector<8x8xf32>
      %50 = arith.mulf %46, %49 : vector<8x8xf32>
      %51 = arith.truncf %50 : vector<8x8xf32> to vector<8x8xbf16>
      %c0_39 = arith.constant 0 : index
      %c0_40 = arith.constant 0 : index
      %c0_41 = arith.constant 0 : index
      %c0_42 = arith.constant 0 : index
      %52 = vector.load %arg9[%c0_39, %c0_40, %c0_41, %c0_42] : memref<1x1x8x8xbf16, #tpu.memory_space<vmem>>, vector<1x1x8x8xbf16>
      %53 = vector.shape_cast %52 : vector<1x1x8x8xbf16> to vector<8x8xbf16>
      %54 = vector.shape_cast %51 : vector<8x8xbf16> to vector<1x1x8x8xbf16>
      tpu.vector_store %arg9[%c0_39, %c0_40, %c0_41, %c0_42], %54 {strides = array<i32>} : memref<1x1x8x8xbf16, #tpu.memory_space<vmem>>, vector<1x1x8x8xbf16>,
    } else {
    }
    return
  }
  func.func @transform_0(%arg0: i32, %arg1: i32, %arg2: i32, %arg3: i32) -> (i32, i32, i32) {
    %c0_i32 = arith.constant 0 : i32
    %c0_i32_0 = arith.constant 0 : i32
    return %arg0, %arg2, %c0_i32 : i32, i32, i32
  }
  func.func @transform_1(%arg0: i32, %arg1: i32, %arg2: i32, %arg3: i32) -> (i32, i32, i32) {
    %c0_i32 = arith.constant 0 : i32
    %c0_i32_0 = arith.constant 0 : i32
    return %arg0, %c0_i32, %arg3 : i32, i32, i32
  }
  func.func @transform_2(%arg0: i32, %arg1: i32, %arg2: i32, %arg3: i32) -> (i32, i32, i32, i32) {
    %c0_i32 = arith.constant 0 : i32
    %c0_i32_0 = arith.constant 0 : i32
    return %arg0, %arg1, %arg2, %c0_i32 : i32, i32, i32, i32
  }
  func.func @transform_3(%arg0: i32, %arg1: i32, %arg2: i32, %arg3: i32) -> (i32, i32, i32, i32) {
    %c0_i32 = arith.constant 0 : i32
    %c0_i32_0 = arith.constant 0 : i32
    return %arg0, %arg1, %arg3, %c0_i32 : i32, i32, i32, i32
  }
  func.func @transform_4(%arg0: i32, %arg1: i32, %arg2: i32, %arg3: i32) -> (i32, i32, i32, i32) {
    %c0_i32 = arith.constant 0 : i32
    %c0_i32_0 = arith.constant 0 : i32
    return %arg0, %arg1, %arg3, %c0_i32 : i32, i32, i32, i32
  }
  func.func @transform_5(%arg0: i32, %arg1: i32, %arg2: i32, %arg3: i32) -> (i32, i32, i32, i32) {
    %c0_i32 = arith.constant 0 : i32
    %c0_i32_0 = arith.constant 0 : i32
    return %arg0, %arg1, %arg2, %c0_i32 : i32, i32, i32, i32
  }
}

module attributes {stable_mosaic.version = 11 : i64} {
  func.func @_ffn_ln_kernel(%arg0: i32, %arg1: i32, %arg2: memref<16x32xf32, #tpu.memory_space<vmem>>, %arg3: memref<32x64xbf16, #tpu.memory_space<vmem>>, %arg4: memref<1x64xf32, #tpu.memory_space<vmem>>, %arg5: memref<64x32xbf16, #tpu.memory_space<vmem>>, %arg6: memref<1x32xf32, #tpu.memory_space<vmem>>, %arg7: memref<1x32xf32, #tpu.memory_space<vmem>>, %arg8: memref<1x32xf32, #tpu.memory_space<vmem>>, %arg9: memref<16x32xf32, #tpu.memory_space<vmem>>, %arg10: memref<16x32xf32, #tpu.memory_space<vmem>>) attributes {dimension_semantics = [#tpu.dimension_semantics<parallel>, #tpu.dimension_semantics<arbitrary>], iteration_bounds = array<i64: 1, 1>, scalar_prefetch = 0 : i64, scratch_operands = 1 : i64, tpu.core_type = #tpu.core_type<tc>, window_params = [{transform_indices = @transform_0, window_bounds = array<i64: 16, 32>}, {transform_indices = @transform_1, window_bounds = array<i64: 32, 64>}, {transform_indices = @transform_2, window_bounds = array<i64: 1, 64>}, {transform_indices = @transform_3, window_bounds = array<i64: 64, 32>}, {pipeline_mode = #tpu.pipeline_mode<synchronous>, transform_indices = @transform_4, window_bounds = array<i64: 1, 32>}, {pipeline_mode = #tpu.pipeline_mode<synchronous>, transform_indices = @transform_5, window_bounds = array<i64: 1, 32>}, {pipeline_mode = #tpu.pipeline_mode<synchronous>, transform_indices = @transform_6, window_bounds = array<i64: 1, 32>}, {transform_indices = @transform_7, window_bounds = array<i64: 16, 32>}]} {
    %c0_i32 = arith.constant 0 : i32
    %0 = arith.cmpi eq, %arg1, %c0_i32 : i32
    %1 = arith.extui %0 : i1 to i32
    %c0_i32_0 = arith.constant 0 : i32
    %2 = arith.cmpi ne, %1, %c0_i32_0 : i32
    scf.if %2 {
      %cst_16 = arith.constant 0.000000e+00 : f32
      %21 = vector.broadcast %cst_16 : f32 to vector<16x32xf32>
      %c0_17 = arith.constant 0 : index
      %c0_18 = arith.constant 0 : index
      %22 = vector.load %arg10[%c0_17, %c0_18] : memref<16x32xf32, #tpu.memory_space<vmem>>, vector<16x32xf32>
      tpu.vector_store %arg10[%c0_17, %c0_18], %21 {strides = array<i32>} : memref<16x32xf32, #tpu.memory_space<vmem>>, vector<16x32xf32>,
    } else {
    }
    %c0 = arith.constant 0 : index
    %c0_1 = arith.constant 0 : index
    %3 = vector.load %arg2[%c0, %c0_1] : memref<16x32xf32, #tpu.memory_space<vmem>>, vector<16x32xf32>
    %4 = arith.truncf %3 : vector<16x32xf32> to vector<16x32xbf16>
    %c0_2 = arith.constant 0 : index
    %c0_3 = arith.constant 0 : index
    %5 = vector.load %arg3[%c0_2, %c0_3] : memref<32x64xbf16, #tpu.memory_space<vmem>>, vector<32x64xbf16>
    %cst = arith.constant dense<0.000000e+00> : vector<16x64xf32>
    %6 = tpu.matmul %4, %5, %cst {dimension_numbers = #tpu.dot_dimension_numbers<[1], [0], [0], [1], [0, 0, 1, 1], [], []>} : vector<16x32xbf16>, vector<32x64xbf16>, vector<16x64xf32> -> vector<16x64xf32>
    %c0_4 = arith.constant 0 : index
    %c0_5 = arith.constant 0 : index
    %7 = vector.load %arg4[%c0_4, %c0_5] : memref<1x64xf32, #tpu.memory_space<vmem>>, vector<1x64xf32>
    %8 = vector.broadcast %7 : vector<1x64xf32> to vector<16x64xf32>
    %9 = arith.addf %6, %8 : vector<16x64xf32>
    %cst_6 = arith.constant 0.000000e+00 : f32
    %10 = vector.broadcast %cst_6 : f32 to vector<16x64xf32>
    %11 = arith.maximumf %9, %10 : vector<16x64xf32>
    %c0_7 = arith.constant 0 : index
    %c0_8 = arith.constant 0 : index
    %12 = vector.load %arg10[%c0_7, %c0_8] : memref<16x32xf32, #tpu.memory_space<vmem>>, vector<16x32xf32>
    %13 = arith.truncf %11 : vector<16x64xf32> to vector<16x64xbf16>
    %c0_9 = arith.constant 0 : index
    %c0_10 = arith.constant 0 : index
    %14 = vector.load %arg5[%c0_9, %c0_10] : memref<64x32xbf16, #tpu.memory_space<vmem>>, vector<64x32xbf16>
    %cst_11 = arith.constant dense<0.000000e+00> : vector<16x32xf32>
    %15 = tpu.matmul %13, %14, %cst_11 {dimension_numbers = #tpu.dot_dimension_numbers<[1], [0], [0], [1], [0, 0, 1, 1], [], []>} : vector<16x64xbf16>, vector<64x32xbf16>, vector<16x32xf32> -> vector<16x32xf32>
    %16 = arith.addf %12, %15 : vector<16x32xf32>
    %c0_12 = arith.constant 0 : index
    %c0_13 = arith.constant 0 : index
    %17 = vector.load %arg10[%c0_12, %c0_13] : memref<16x32xf32, #tpu.memory_space<vmem>>, vector<16x32xf32>
    tpu.vector_store %arg10[%c0_12, %c0_13], %16 {strides = array<i32>} : memref<16x32xf32, #tpu.memory_space<vmem>>, vector<16x32xf32>,
    %c0_i32_14 = arith.constant 0 : i32
    %18 = arith.cmpi eq, %arg1, %c0_i32_14 : i32
    %19 = arith.extui %18 : i1 to i32
    %c0_i32_15 = arith.constant 0 : i32
    %20 = arith.cmpi ne, %19, %c0_i32_15 : i32
    scf.if %20 {
      %c0_16 = arith.constant 0 : index
      %c0_17 = arith.constant 0 : index
      %21 = vector.load %arg10[%c0_16, %c0_17] : memref<16x32xf32, #tpu.memory_space<vmem>>, vector<16x32xf32>
      %c0_18 = arith.constant 0 : index
      %c0_19 = arith.constant 0 : index
      %22 = vector.load %arg6[%c0_18, %c0_19] : memref<1x32xf32, #tpu.memory_space<vmem>>, vector<1x32xf32>
      %23 = vector.broadcast %22 : vector<1x32xf32> to vector<16x32xf32>
      %24 = arith.addf %21, %23 : vector<16x32xf32>
      %c0_20 = arith.constant 0 : index
      %c0_21 = arith.constant 0 : index
      %25 = vector.load %arg2[%c0_20, %c0_21] : memref<16x32xf32, #tpu.memory_space<vmem>>, vector<16x32xf32>
      %26 = arith.addf %24, %25 : vector<16x32xf32>
      %cst_22 = arith.constant dense<0.000000e+00> : vector<16xf32>
      %27 = vector.multi_reduction <add>, %26, %cst_22 [1] : vector<16x32xf32> to vector<16xf32>
      %28 = vector.shape_cast %27 : vector<16xf32> to vector<16x1xf32>
      %cst_23 = arith.constant 3.200000e+01 : f32
      %29 = vector.broadcast %cst_23 : f32 to vector<16x1xf32>
      %30 = arith.divf %28, %29 : vector<16x1xf32>
      %31 = vector.broadcast %30 : vector<16x1xf32> to vector<16x32xf32>
      %32 = arith.subf %26, %31 : vector<16x32xf32>
      %33 = arith.mulf %32, %32 : vector<16x32xf32>
      %cst_24 = arith.constant dense<0.000000e+00> : vector<16xf32>
      %34 = vector.multi_reduction <add>, %33, %cst_24 [1] : vector<16x32xf32> to vector<16xf32>
      %35 = vector.shape_cast %34 : vector<16xf32> to vector<16x1xf32>
      %cst_25 = arith.constant 3.200000e+01 : f32
      %36 = vector.broadcast %cst_25 : f32 to vector<16x1xf32>
      %37 = arith.divf %35, %36 : vector<16x1xf32>
      %38 = vector.broadcast %30 : vector<16x1xf32> to vector<16x32xf32>
      %39 = arith.subf %26, %38 : vector<16x32xf32>
      %cst_26 = arith.constant 9.99999974E-6 : f32
      %40 = vector.broadcast %cst_26 : f32 to vector<16x1xf32>
      %41 = arith.addf %37, %40 : vector<16x1xf32>
      %42 = math.rsqrt %41 : vector<16x1xf32>
      %43 = vector.broadcast %42 : vector<16x1xf32> to vector<16x32xf32>
      %44 = arith.mulf %39, %43 : vector<16x32xf32>
      %c0_27 = arith.constant 0 : index
      %c0_28 = arith.constant 0 : index
      %45 = vector.load %arg7[%c0_27, %c0_28] : memref<1x32xf32, #tpu.memory_space<vmem>>, vector<1x32xf32>
      %46 = vector.broadcast %45 : vector<1x32xf32> to vector<16x32xf32>
      %47 = arith.mulf %44, %46 : vector<16x32xf32>
      %c0_29 = arith.constant 0 : index
      %c0_30 = arith.constant 0 : index
      %48 = vector.load %arg8[%c0_29, %c0_30] : memref<1x32xf32, #tpu.memory_space<vmem>>, vector<1x32xf32>
      %49 = vector.broadcast %48 : vector<1x32xf32> to vector<16x32xf32>
      %50 = arith.addf %47, %49 : vector<16x32xf32>
      %c0_31 = arith.constant 0 : index
      %c0_32 = arith.constant 0 : index
      %51 = vector.load %arg9[%c0_31, %c0_32] : memref<16x32xf32, #tpu.memory_space<vmem>>, vector<16x32xf32>
      tpu.vector_store %arg9[%c0_31, %c0_32], %50 {strides = array<i32>} : memref<16x32xf32, #tpu.memory_space<vmem>>, vector<16x32xf32>,
    } else {
    }
    return
  }
  func.func @transform_0(%arg0: i32, %arg1: i32) -> (i32, i32) {
    %c0_i32 = arith.constant 0 : i32
    %c0_i32_0 = arith.constant 0 : i32
    return %arg0, %c0_i32 : i32, i32
  }
  func.func @transform_1(%arg0: i32, %arg1: i32) -> (i32, i32) {
    %c0_i32 = arith.constant 0 : i32
    %c0_i32_0 = arith.constant 0 : i32
    return %c0_i32, %arg1 : i32, i32
  }
  func.func @transform_2(%arg0: i32, %arg1: i32) -> (i32, i32) {
    %c0_i32 = arith.constant 0 : i32
    %c0_i32_0 = arith.constant 0 : i32
    return %c0_i32, %arg1 : i32, i32
  }
  func.func @transform_3(%arg0: i32, %arg1: i32) -> (i32, i32) {
    %c0_i32 = arith.constant 0 : i32
    %c0_i32_0 = arith.constant 0 : i32
    return %arg1, %c0_i32 : i32, i32
  }
  func.func @transform_4(%arg0: i32, %arg1: i32) -> (i32, i32) {
    %c0_i32 = arith.constant 0 : i32
    %c0_i32_0 = arith.constant 0 : i32
    %c0_i32_1 = arith.constant 0 : i32
    return %c0_i32, %c0_i32_0 : i32, i32
  }
  func.func @transform_5(%arg0: i32, %arg1: i32) -> (i32, i32) {
    %c0_i32 = arith.constant 0 : i32
    %c0_i32_0 = arith.constant 0 : i32
    %c0_i32_1 = arith.constant 0 : i32
    return %c0_i32, %c0_i32_0 : i32, i32
  }
  func.func @transform_6(%arg0: i32, %arg1: i32) -> (i32, i32) {
    %c0_i32 = arith.constant 0 : i32
    %c0_i32_0 = arith.constant 0 : i32
    %c0_i32_1 = arith.constant 0 : i32
    return %c0_i32, %c0_i32_0 : i32, i32
  }
  func.func @transform_7(%arg0: i32, %arg1: i32) -> (i32, i32) {
    %c0_i32 = arith.constant 0 : i32
    %c0_i32_0 = arith.constant 0 : i32
    return %arg0, %c0_i32 : i32, i32
  }
}

module attributes {stable_mosaic.version = 11 : i64} {
  func.func @_linear_kernel(%arg0: i32, %arg1: i32, %arg2: i32, %arg3: memref<16x32xf32, #tpu.memory_space<vmem>>, %arg4: memref<32x64xbf16, #tpu.memory_space<vmem>>, %arg5: memref<1x64xf32, #tpu.memory_space<vmem>>, %arg6: memref<16x64xbf16, #tpu.memory_space<vmem>>, %arg7: memref<16x64xf32, #tpu.memory_space<vmem>>) attributes {dimension_semantics = [#tpu.dimension_semantics<parallel>, #tpu.dimension_semantics<parallel>, #tpu.dimension_semantics<arbitrary>], iteration_bounds = array<i64: 1, 1, 1>, scalar_prefetch = 0 : i64, scratch_operands = 1 : i64, tpu.core_type = #tpu.core_type<tc>, window_params = [{transform_indices = @transform_0, window_bounds = array<i64: 16, 32>}, {transform_indices = @transform_1, window_bounds = array<i64: 32, 64>}, {transform_indices = @transform_2, window_bounds = array<i64: 1, 64>}, {transform_indices = @transform_3, window_bounds = array<i64: 16, 64>}]} {
    %c0_i32 = arith.constant 0 : i32
    %0 = arith.cmpi eq, %arg2, %c0_i32 : i32
    %1 = arith.extui %0 : i1 to i32
    %c0_i32_0 = arith.constant 0 : i32
    %2 = arith.cmpi ne, %1, %c0_i32_0 : i32
    scf.if %2 {
      %cst_10 = arith.constant 0.000000e+00 : f32
      %13 = vector.broadcast %cst_10 : f32 to vector<16x64xf32>
      %c0_11 = arith.constant 0 : index
      %c0_12 = arith.constant 0 : index
      %14 = vector.load %arg7[%c0_11, %c0_12] : memref<16x64xf32, #tpu.memory_space<vmem>>, vector<16x64xf32>
      tpu.vector_store %arg7[%c0_11, %c0_12], %13 {strides = array<i32>} : memref<16x64xf32, #tpu.memory_space<vmem>>, vector<16x64xf32>,
    } else {
    }
    %c0 = arith.constant 0 : index
    %c0_1 = arith.constant 0 : index
    %3 = vector.load %arg7[%c0, %c0_1] : memref<16x64xf32, #tpu.memory_space<vmem>>, vector<16x64xf32>
    %c0_2 = arith.constant 0 : index
    %c0_3 = arith.constant 0 : index
    %4 = vector.load %arg3[%c0_2, %c0_3] : memref<16x32xf32, #tpu.memory_space<vmem>>, vector<16x32xf32>
    %5 = arith.truncf %4 : vector<16x32xf32> to vector<16x32xbf16>
    %c0_4 = arith.constant 0 : index
    %c0_5 = arith.constant 0 : index
    %6 = vector.load %arg4[%c0_4, %c0_5] : memref<32x64xbf16, #tpu.memory_space<vmem>>, vector<32x64xbf16>
    %cst = arith.constant dense<0.000000e+00> : vector<16x64xf32>
    %7 = tpu.matmul %5, %6, %cst {dimension_numbers = #tpu.dot_dimension_numbers<[1], [0], [0], [1], [0, 0, 1, 1], [], []>} : vector<16x32xbf16>, vector<32x64xbf16>, vector<16x64xf32> -> vector<16x64xf32>
    %8 = arith.addf %3, %7 : vector<16x64xf32>
    %c0_6 = arith.constant 0 : index
    %c0_7 = arith.constant 0 : index
    %9 = vector.load %arg7[%c0_6, %c0_7] : memref<16x64xf32, #tpu.memory_space<vmem>>, vector<16x64xf32>
    tpu.vector_store %arg7[%c0_6, %c0_7], %8 {strides = array<i32>} : memref<16x64xf32, #tpu.memory_space<vmem>>, vector<16x64xf32>,
    %c0_i32_8 = arith.constant 0 : i32
    %10 = arith.cmpi eq, %arg2, %c0_i32_8 : i32
    %11 = arith.extui %10 : i1 to i32
    %c0_i32_9 = arith.constant 0 : i32
    %12 = arith.cmpi ne, %11, %c0_i32_9 : i32
    scf.if %12 {
      %c0_10 = arith.constant 0 : index
      %c0_11 = arith.constant 0 : index
      %13 = vector.load %arg7[%c0_10, %c0_11] : memref<16x64xf32, #tpu.memory_space<vmem>>, vector<16x64xf32>
      %c0_12 = arith.constant 0 : index
      %c0_13 = arith.constant 0 : index
      %14 = vector.load %arg5[%c0_12, %c0_13] : memref<1x64xf32, #tpu.memory_space<vmem>>, vector<1x64xf32>
      %15 = vector.broadcast %14 : vector<1x64xf32> to vector<16x64xf32>
      %16 = arith.addf %13, %15 : vector<16x64xf32>
      %17 = arith.truncf %16 : vector<16x64xf32> to vector<16x64xbf16>
      %c0_14 = arith.constant 0 : index
      %c0_15 = arith.constant 0 : index
      %18 = vector.load %arg6[%c0_14, %c0_15] : memref<16x64xbf16, #tpu.memory_space<vmem>>, vector<16x64xbf16>
      tpu.vector_store %arg6[%c0_14, %c0_15], %17 {strides = array<i32>} : memref<16x64xbf16, #tpu.memory_space<vmem>>, vector<16x64xbf16>,
    } else {
    }
    return
  }
  func.func @transform_0(%arg0: i32, %arg1: i32, %arg2: i32) -> (i32, i32) {
    %c0_i32 = arith.constant 0 : i32
    return %arg0, %arg2 : i32, i32
  }
  func.func @transform_1(%arg0: i32, %arg1: i32, %arg2: i32) -> (i32, i32) {
    %c0_i32 = arith.constant 0 : i32
    return %arg2, %arg1 : i32, i32
  }
  func.func @transform_2(%arg0: i32, %arg1: i32, %arg2: i32) -> (i32, i32) {
    %c0_i32 = arith.constant 0 : i32
    %c0_i32_0 = arith.constant 0 : i32
    return %c0_i32, %arg1 : i32, i32
  }
  func.func @transform_3(%arg0: i32, %arg1: i32, %arg2: i32) -> (i32, i32) {
    %c0_i32 = arith.constant 0 : i32
    return %arg0, %arg1 : i32, i32
  }
}

module attributes {stable_mosaic.version = 11 : i64} {
  func.func @_linear_kernel(%arg0: i32, %arg1: i32, %arg2: i32, %arg3: memref<16x32xf32, #tpu.memory_space<vmem>>, %arg4: memref<32x24xbf16, #tpu.memory_space<vmem>>, %arg5: memref<1x24xf32, #tpu.memory_space<vmem>>, %arg6: memref<16x24xf32, #tpu.memory_space<vmem>>, %arg7: memref<16x24xf32, #tpu.memory_space<vmem>>) attributes {dimension_semantics = [#tpu.dimension_semantics<parallel>, #tpu.dimension_semantics<parallel>, #tpu.dimension_semantics<arbitrary>], iteration_bounds = array<i64: 1, 1, 1>, scalar_prefetch = 0 : i64, scratch_operands = 1 : i64, tpu.core_type = #tpu.core_type<tc>, window_params = [{transform_indices = @transform_0, window_bounds = array<i64: 16, 32>}, {transform_indices = @transform_1, window_bounds = array<i64: 32, 24>}, {transform_indices = @transform_2, window_bounds = array<i64: 1, 24>}, {transform_indices = @transform_3, window_bounds = array<i64: 16, 24>}]} {
    %c0_i32 = arith.constant 0 : i32
    %0 = arith.cmpi eq, %arg2, %c0_i32 : i32
    %1 = arith.extui %0 : i1 to i32
    %c0_i32_0 = arith.constant 0 : i32
    %2 = arith.cmpi ne, %1, %c0_i32_0 : i32
    scf.if %2 {
      %cst_10 = arith.constant 0.000000e+00 : f32
      %13 = vector.broadcast %cst_10 : f32 to vector<16x24xf32>
      %c0_11 = arith.constant 0 : index
      %c0_12 = arith.constant 0 : index
      %14 = vector.load %arg7[%c0_11, %c0_12] : memref<16x24xf32, #tpu.memory_space<vmem>>, vector<16x24xf32>
      tpu.vector_store %arg7[%c0_11, %c0_12], %13 {strides = array<i32>} : memref<16x24xf32, #tpu.memory_space<vmem>>, vector<16x24xf32>,
    } else {
    }
    %c0 = arith.constant 0 : index
    %c0_1 = arith.constant 0 : index
    %3 = vector.load %arg7[%c0, %c0_1] : memref<16x24xf32, #tpu.memory_space<vmem>>, vector<16x24xf32>
    %c0_2 = arith.constant 0 : index
    %c0_3 = arith.constant 0 : index
    %4 = vector.load %arg3[%c0_2, %c0_3] : memref<16x32xf32, #tpu.memory_space<vmem>>, vector<16x32xf32>
    %5 = arith.truncf %4 : vector<16x32xf32> to vector<16x32xbf16>
    %c0_4 = arith.constant 0 : index
    %c0_5 = arith.constant 0 : index
    %6 = vector.load %arg4[%c0_4, %c0_5] : memref<32x24xbf16, #tpu.memory_space<vmem>>, vector<32x24xbf16>
    %cst = arith.constant dense<0.000000e+00> : vector<16x24xf32>
    %7 = tpu.matmul %5, %6, %cst {dimension_numbers = #tpu.dot_dimension_numbers<[1], [0], [0], [1], [0, 0, 1, 1], [], []>} : vector<16x32xbf16>, vector<32x24xbf16>, vector<16x24xf32> -> vector<16x24xf32>
    %8 = arith.addf %3, %7 : vector<16x24xf32>
    %c0_6 = arith.constant 0 : index
    %c0_7 = arith.constant 0 : index
    %9 = vector.load %arg7[%c0_6, %c0_7] : memref<16x24xf32, #tpu.memory_space<vmem>>, vector<16x24xf32>
    tpu.vector_store %arg7[%c0_6, %c0_7], %8 {strides = array<i32>} : memref<16x24xf32, #tpu.memory_space<vmem>>, vector<16x24xf32>,
    %c0_i32_8 = arith.constant 0 : i32
    %10 = arith.cmpi eq, %arg2, %c0_i32_8 : i32
    %11 = arith.extui %10 : i1 to i32
    %c0_i32_9 = arith.constant 0 : i32
    %12 = arith.cmpi ne, %11, %c0_i32_9 : i32
    scf.if %12 {
      %c0_10 = arith.constant 0 : index
      %c0_11 = arith.constant 0 : index
      %13 = vector.load %arg7[%c0_10, %c0_11] : memref<16x24xf32, #tpu.memory_space<vmem>>, vector<16x24xf32>
      %c0_12 = arith.constant 0 : index
      %c0_13 = arith.constant 0 : index
      %14 = vector.load %arg5[%c0_12, %c0_13] : memref<1x24xf32, #tpu.memory_space<vmem>>, vector<1x24xf32>
      %15 = vector.broadcast %14 : vector<1x24xf32> to vector<16x24xf32>
      %16 = arith.addf %13, %15 : vector<16x24xf32>
      %c0_14 = arith.constant 0 : index
      %c0_15 = arith.constant 0 : index
      %17 = vector.load %arg6[%c0_14, %c0_15] : memref<16x24xf32, #tpu.memory_space<vmem>>, vector<16x24xf32>
      tpu.vector_store %arg6[%c0_14, %c0_15], %16 {strides = array<i32>} : memref<16x24xf32, #tpu.memory_space<vmem>>, vector<16x24xf32>,
    } else {
    }
    return
  }
  func.func @transform_0(%arg0: i32, %arg1: i32, %arg2: i32) -> (i32, i32) {
    %c0_i32 = arith.constant 0 : i32
    return %arg0, %arg2 : i32, i32
  }
  func.func @transform_1(%arg0: i32, %arg1: i32, %arg2: i32) -> (i32, i32) {
    %c0_i32 = arith.constant 0 : i32
    return %arg2, %arg1 : i32, i32
  }
  func.func @transform_2(%arg0: i32, %arg1: i32, %arg2: i32) -> (i32, i32) {
    %c0_i32 = arith.constant 0 : i32
    %c0_i32_0 = arith.constant 0 : i32
    return %c0_i32, %arg1 : i32, i32
  }
  func.func @transform_3(%arg0: i32, %arg1: i32, %arg2: i32) -> (i32, i32) {
    %c0_i32 = arith.constant 0 : i32
    return %arg0, %arg1 : i32, i32
  }
}

</mosaic_0001>

<bundles_post_ra>
// kernel: transformer_forward.33
= control target key start
LH: loop header
LB: loop body
LE: loop exit
PB: predicated region body
PF: predicated region fallthrough
CT: control target
= control target key end

     0   :  { %vm19_vm0 = vcmask 785408   ;;  %v145_v0 = vmov 0.0   ;;  %vm146_vm1 = vmmov 0   ;;  %vm43_vm2 = vcmask 261120   ;;  %s192_s1 = inlined_call_operand.vmem [shape: bf16[32,96], index: 1, kind: input, shape index: {}]   ;;  %s193_s0 = inlined_call_operand.vmem [shape: f32[16,32], index: 0, kind: input, shape index: {}]   ;;  %s194_s2 = inlined_call_operand.vmem [shape: f32[1,96], index: 2, kind: input, shape index: {}]   ;;  %s195_s3 = inlined_call_operand.vmem [shape: bf16[16,96], index: 3, kind: output, shape index: {}]  }
   0x1   :  { %133 = vmatprep.subr.bf16.mxu0 %v145_v0  ;;  %v143_v1 = vld [vmem:[%s192_s1] sm:$0xff]   ;;  %137 = vmatprep.mubr.msk.bf16.mxu0 %vm146_vm1, %v145_v0  ;;  %20 = vst.msk [vmem:[#allocation2] sm:$0xff] %vm19_vm0, %v145_v0  ;;  %21 = vst.msk [vmem:[#allocation2 + $0x8] sm:$0xff] %vm19_vm0, %v145_v0  ;;  %v144_v2 = vld [vmem:[%s192_s1 + $0x8] sm:$0xff]   ;;  %vm115_vm3 = vcmask 781312  }
   0x2   :  { %134 = vmatpush3.bf16.msra.mxu0 %v143_v1  ;;  %v24_v3 = vld [vmem:[%s193_s0] sm:$0xff]  ;;  %v25_v4 = vld [vmem:[%s193_s0 + $0x8] sm:$0xff] }
   0x3   :  { %135 = vmatprep.subr.bf16.mxu0 %v145_v0  ;;  %v26_v5 = vpack.c.bf16 %v25_v4, %v24_v3  ;;  %v125_v14 = vld [vmem:[%s194_s2] ss:$0 sm:$0xff] }
   0x6   :  { %136 = vmatpush3.bf16.msra.mxu0 %v144_v2 }
   0x8   :  { %v22_v6 = vld [vmem:[#allocation2] sm:$0xff]  ;;  %v23_v8 = vld [vmem:[#allocation2 + $0x8] sm:$0xff] }
   0x9   :  { %138 = vmatmul.mubr.msk.bf16.vlgmr.msra.gmra.mrb[0].mxu0 %vm43_vm2, %v26_v5 }
  0xdc   :  { %v81_v7 = vpop.f32.mrb[0].mxu0 }
  0xdd   :  { %v88_v9 = vadd.f32 %v81_v7, %v22_v6  ;;  %v139_v10 = vpop.f32.mrb[1].mxu0 }
  0xde   :  { %v84_v11 = vpop.f32.mrb[2].mxu0 }
  0xdf   :  { %91 = vst.msk [vmem:[#allocation2] sm:$0xff] %vm19_vm0, %v88_v9  ;;  %v89_v12 = vadd.f32 %v84_v11, %v23_v8  ;;  %v140_v13 = vpop.f32.mrb[3].mxu0 }
  0xe1   :  { %92 = vst.msk [vmem:[#allocation2 + $0x8] sm:$0xff] %vm19_vm0, %v89_v12 }
  0xe6   :  { %v96_v15 = vld [vmem:[#allocation2] sm:$0xff] }
  0xe7   :  { %v105_v16 = vadd.f32 %v125_v14, %v96_v15 }
  0xe8   :  { %v97_v17 = vld [vmem:[#allocation2 + $0x8] sm:$0xff] }
  0xe9   :  { %v128_v18 = vpack.c.bf16 %v105_v16, %v105_v16  ;;  %v106_v19 = vadd.f32 %v125_v14, %v97_v17 }
  0xeb   :  { %116 = vst.msk [vmem:[%s195_s3] sm:$0xf] %vm115_vm3, %v128_v18  ;;  %v129_v20 = vpack.c.bf16 %v106_v19, %v106_v19 }
  0xed   :  { %117 = vst.msk [vmem:[%s195_s3 + $0x4] sm:$0xf] %vm115_vm3, %v129_v20 }

// kernel: transformer_forward.35
= control target key start
LH: loop header
LB: loop body
LE: loop exit
PB: predicated region body
PF: predicated region fallthrough
CT: control target
= control target key end

     0   :  { %vm28_vm0 = vcmask 261120   ;;  %v201_v0 = vmov 0.0   ;;  %vm202_vm1 = vmmov 0   ;;  %s279_s1 = inlined_call_operand.vmem [shape: bf16[32,32], index: 1, kind: input, shape index: {}]   ;;  %s280_s0 = inlined_call_operand.vmem [shape: bf16[16,32], index: 0, kind: input, shape index: {}]   ;;  %s281_s2 = inlined_call_operand.vmem [shape: f32[1,32], index: 2, kind: input, shape index: {}]   ;;  %s282_s3 = inlined_call_operand.vmem [shape: f32[16,32], index: 3, kind: input, shape index: {}]   ;;  %s283_s4 = inlined_call_operand.vmem [shape: f32[1,32], index: 4, kind: input, shape index: {}]   ;;  %s284_s5 = inlined_call_operand.vmem [shape: f32[1,32], index: 5, kind: input, shape index: {}]   ;;  %s285_s6 = inlined_call_operand.vmem [shape: f32[16,32], index: 6, kind: output, shape index: {}]  }
   0x1   :  { %184 = vmatprep.subr.bf16.mxu0 %v201_v0  ;;  %v194_v1 = vld [vmem:[%s279_s1] sm:$0xff]   ;;  %188 = vmatprep.mubr.msk.bf16.mxu0 %vm202_vm1, %v201_v0  ;;  %29 = vst.msk [vmem:[#allocation2] sm:$0xff] %vm28_vm0, %v201_v0  ;;  %30 = vst.msk [vmem:[#allocation2 + $0x8] sm:$0xff] %vm28_vm0, %v201_v0  ;;  %v195_v2 = vld [vmem:[%s279_s1 + $0x8] sm:$0xff]  }
   0x2   :  { %185 = vmatpush3.bf16.msra.mxu0 %v194_v1  ;;  %v196_v3 = vld [vmem:[%s280_s0] sm:$0xff]   ;;  %v120_v17 = vld [vmem:[%s282_s3 + $0x8] sm:$0xff] }
   0x3   :  { %186 = vmatprep.subr.bf16.mxu0 %v201_v0  ;;  %v178_v12 = vld [vmem:[%s281_s2] ss:$0 sm:$0xff] }
   0x4   :  { %v119_v14 = vld [vmem:[%s282_s3] sm:$0xff] }
   0x5   :  { %v179_v40 = vld [vmem:[%s283_s4] ss:$0 sm:$0xff] }
   0x6   :  { %187 = vmatpush3.bf16.msra.mxu0 %v195_v2  ;;  %v180_v42 = vld [vmem:[%s284_s5] ss:$0 sm:$0xff] }
   0x8   :  { %v31_v4 = vld [vmem:[#allocation2] sm:$0xff]  ;;  %v32_v6 = vld [vmem:[#allocation2 + $0x8] sm:$0xff] }
   0x9   :  { %189 = vmatmul.mubr.msk.bf16.vlgmr.msra.gmra.mrb[0].mxu0 %vm28_vm0, %v196_v3 }
  0xdc   :  { %v94_v5 = vpop.f32.mrb[0].mxu0 }
  0xdd   :  { %v101_v7 = vadd.f32 %v94_v5, %v31_v4  ;;  %v190_v8 = vpop.f32.mrb[1].mxu0 }
  0xde   :  { %v97_v9 = vpop.f32.mrb[2].mxu0 }
  0xdf   :  { %103 = vst.msk [vmem:[#allocation2] sm:$0xff] %vm28_vm0, %v101_v7  ;;  %v102_v10 = vadd.f32 %v97_v9, %v32_v6  ;;  %v191_v11 = vpop.f32.mrb[3].mxu0 }
  0xe1   :  { %104 = vst.msk [vmem:[#allocation2 + $0x8] sm:$0xff] %vm28_vm0, %v102_v10 }
  0xe6   :  { %v108_v13 = vld [vmem:[#allocation2] sm:$0xff] }
  0xe7   :  { %v117_v15 = vadd.f32 %v178_v12, %v108_v13 }
  0xe8   :  { %v109_v16 = vld [vmem:[#allocation2 + $0x8] sm:$0xff] }
  0xe9   :  { %v121_v18 = vadd.f32 %v119_v14, %v117_v15  ;;  %v118_v19 = vadd.f32 %v178_v12, %v109_v16 }
  0xeb   :  { %v123_v20 = vsel %vm28_vm0, %v121_v18, 0.0  ;;  %v122_v21 = vadd.f32 %v120_v17, %v118_v19 }
  0xec   :  { %124 = vadd.xlane.f32.xlu0 %v123_v20 }
  0xed   :  { %v126_v22 = vsel %vm28_vm0, %v122_v21, 0.0 }
  0xf0   :  { %127 = vadd.xlane.f32.xlu0 %v126_v22 }
 0x179   :  { %v125_v23 = vpop.xlane.xlu0 %124 }
 0x17a   :  { %v130_v24 = vmul.f32 0.03125, %v125_v23 }
 0x17c   :  { %v132_v25 = vsub.f32 %v121_v18, %v130_v24 }
 0x17d   :  { %v128_v26 = vpop.xlane.xlu0 %127 }
 0x17e   :  { %v131_v27 = vmul.f32 0.03125, %v128_v26  ;;  %v134_v28 = vmul.f32 %v132_v25, %v132_v25 }
 0x180   :  { %v133_v29 = vsub.f32 %v122_v21, %v131_v27  ;;  %v136_v30 = vsel %vm28_vm0, %v134_v28, 0.0 }
 0x181   :  { %137 = vadd.xlane.f32.xlu1 %v136_v30 }
 0x182   :  { %v135_v31 = vmul.f32 %v133_v29, %v133_v29 }
 0x184   :  { %v139_v32 = vsel %vm28_vm0, %v135_v31, 0.0 }
 0x185   :  { %140 = vadd.xlane.f32.xlu1 %v139_v32 }
 0x20e   :  { %v138_v33 = vpop.xlane.xlu1 %137 }
 0x20f   :  { %v142_v34 = vmul.f32 0.03125, %v138_v33 }
 0x211   :  { %v144_v35 = vadd.f32 1e-05, %v142_v34 }
 0x212   :  { %v141_v36 = vpop.xlane.xlu1 %140 }
 0x213   :  { %197 = vrsqrt.f32 %v144_v35  ;;  %v143_v37 = vmul.f32 0.03125, %v141_v36 }
 0x215   :  { %v145_v38 = vadd.f32 1e-05, %v143_v37 }
 0x217   :  { %199 = vrsqrt.f32 %v145_v38 }
 0x21d   :  { %v198_v39 = vpop.eup %197 }
 0x21e   :  { %v148_v41 = vmul.f32 %v198_v39, %v132_v25 }
 0x220   :  { %v157_v43 = vmul.f32 %v179_v40, %v148_v41 }
 0x221   :  { %v200_v44 = vpop.eup %199 }
 0x222   :  { %v166_v45 = vadd.f32 %v180_v42, %v157_v43  ;;  %v149_v46 = vmul.f32 %v200_v44, %v133_v29 }
 0x224   :  { %168 = vst.msk [vmem:[%s285_s6] sm:$0xff] %vm28_vm0, %v166_v45  ;;  %v158_v47 = vmul.f32 %v179_v40, %v149_v46 }
 0x226   :  { %v167_v48 = vadd.f32 %v180_v42, %v158_v47 }
 0x228   :  { %169 = vst.msk [vmem:[%s285_s6 + $0x8] sm:$0xff] %vm28_vm0, %v167_v48 }

// kernel: transformer_forward.36
= control target key start
LH: loop header
LB: loop body
LE: loop exit
PB: predicated region body
PF: predicated region fallthrough
CT: control target
= control target key end

     0   :  { %vm19_vm0 = vcmask 261120   ;;  %v144_v0 = vmov 0.0   ;;  %vm145_vm1 = vmmov 0   ;;  %vm114_vm2 = vcmask 257024   ;;  %s192_s1 = inlined_call_operand.vmem [shape: bf16[32,32], index: 1, kind: input, shape index: {}]   ;;  %s193_s0 = inlined_call_operand.vmem [shape: f32[16,32], index: 0, kind: input, shape index: {}]   ;;  %s194_s2 = inlined_call_operand.vmem [shape: f32[1,32], index: 2, kind: input, shape index: {}]   ;;  %s195_s3 = inlined_call_operand.vmem [shape: bf16[16,32], index: 3, kind: output, shape index: {}]  }
   0x1   :  { %132 = vmatprep.subr.bf16.mxu0 %v144_v0  ;;  %v142_v1 = vld [vmem:[%s192_s1] sm:$0xff]   ;;  %136 = vmatprep.mubr.msk.bf16.mxu0 %vm145_vm1, %v144_v0  ;;  %20 = vst.msk [vmem:[#allocation2] sm:$0xff] %vm19_vm0, %v144_v0  ;;  %21 = vst.msk [vmem:[#allocation2 + $0x8] sm:$0xff] %vm19_vm0, %v144_v0  ;;  %v143_v2 = vld [vmem:[%s192_s1 + $0x8] sm:$0xff]  }
   0x2   :  { %133 = vmatpush3.bf16.msra.mxu0 %v142_v1  ;;  %v24_v3 = vld [vmem:[%s193_s0] sm:$0xff]  ;;  %v25_v4 = vld [vmem:[%s193_s0 + $0x8] sm:$0xff] }
   0x3   :  { %134 = vmatprep.subr.bf16.mxu0 %v144_v0  ;;  %v26_v5 = vpack.c.bf16 %v25_v4, %v24_v3  ;;  %v124_v14 = vld [vmem:[%s194_s2] ss:$0 sm:$0xff] }
   0x6   :  { %135 = vmatpush3.bf16.msra.mxu0 %v143_v2 }
   0x8   :  { %v22_v6 = vld [vmem:[#allocation2] sm:$0xff]  ;;  %v23_v8 = vld [vmem:[#allocation2 + $0x8] sm:$0xff] }
   0x9   :  { %137 = vmatmul.mubr.msk.bf16.vlgmr.msra.gmra.mrb[0].mxu0 %vm19_vm0, %v26_v5 }
  0xdc   :  { %v81_v7 = vpop.f32.mrb[0].mxu0 }
  0xdd   :  { %v88_v9 = vadd.f32 %v81_v7, %v22_v6  ;;  %v138_v10 = vpop.f32.mrb[1].mxu0 }
  0xde   :  { %v84_v11 = vpop.f32.mrb[2].mxu0 }
  0xdf   :  { %90 = vst.msk [vmem:[#allocation2] sm:$0xff] %vm19_vm0, %v88_v9  ;;  %v89_v12 = vadd.f32 %v84_v11, %v23_v8  ;;  %v139_v13 = vpop.f32.mrb[3].mxu0 }
  0xe1   :  { %91 = vst.msk [vmem:[#allocation2 + $0x8] sm:$0xff] %vm19_vm0, %v89_v12 }
  0xe6   :  { %v95_v15 = vld [vmem:[#allocation2] sm:$0xff] }
  0xe7   :  { %v104_v16 = vadd.f32 %v124_v14, %v95_v15 }
  0xe8   :  { %v96_v17 = vld [vmem:[#allocation2 + $0x8] sm:$0xff] }
  0xe9   :  { %v127_v18 = vpack.c.bf16 %v104_v16, %v104_v16  ;;  %v105_v19 = vadd.f32 %v124_v14, %v96_v17 }
  0xeb   :  { %115 = vst.msk [vmem:[%s195_s3] sm:$0xf] %vm114_vm2, %v127_v18  ;;  %v128_v20 = vpack.c.bf16 %v105_v19, %v105_v19 }
  0xed   :  { %116 = vst.msk [vmem:[%s195_s3 + $0x4] sm:$0xf] %vm114_vm2, %v128_v20 }

// kernel: transformer_forward.34
= control target key start
LH: loop header
LB: loop body
LE: loop exit
PB: predicated region body
PF: predicated region fallthrough
CT: control target
= control target key end

     0   :  { %s947_s18 = smov 0   ;;  %s949_s19 = smov 0   ;;  %s1027_s0 = inlined_call_operand.vmem [shape: f32[2,8,1], index: 0, kind: input, shape index: {}]   ;;  %s1028_s1 = inlined_call_operand.vmem [shape: f32[2,1,8], index: 1, kind: input, shape index: {}]   ;;  %s1029_s2 = inlined_call_operand.vmem [shape: bf16[2,4,8,8], index: 2, kind: input, shape index: {}]   ;;  %s1030_s3 = inlined_call_operand.vmem [shape: bf16[2,4,8,8], index: 3, kind: input, shape index: {}]   ;;  %s1031_s4 = inlined_call_operand.vmem [shape: bf16[2,4,8,8], index: 4, kind: input, shape index: {}]   ;;  %s1032_s5 = inlined_call_operand.vmem [shape: bf16[2,4,8,8], index: 5, kind: output, shape index: {}]  }
   0x1   :  { %s951_s20 = smov 0   ;;  %s953_s21 = smov 0  }
   0x2   :  { %s955_s22 = smov 0  }
   0x3 LB: > { %s37_s23 = sadd.s32 1, %s903_s20  ;;  %s41_s24 = sadd.s32 1, %s907_s21  ;;  %s911_s22 = sphi %s955_s22, %s15_s22   ;;  %s907_s21 = sphi %s953_s21, %s1036_s21   ;;  %s903_s20 = sphi %s951_s20, %s1035_s20   ;;  %s899_s19 = sphi %s949_s19, %s1034_s19   ;;  %s895_s18 = sphi %s947_s18, %s1033_s18  }
   0x4   : > { %p39_p0 = scmp.ge.s32.totalorder %s37_s23, 4  ;;  %p791_p1 = scmp.ge.s32.totalorder %s911_s22, 1 }
   0x5   : > { %p294_p2 = scmp.lt.s32.totalorder %s911_s22, 9 }
   0x6   : > { %s1038_s23 = smov (%p39_p0, %s37_s23), 0  ;;  %s1040_s24 = smov (!%p39_p0, %s41_s24), %s907_s21 }
   0x7   : > { %p295_p3 = pnand %p791_p1, %p294_p2  ;;  %p43_p4 = scmp.ge.s32.totalorder %s1040_s24, 2 }
   0x8   : > { %p369_p5 = scmp.lt.s32.totalorder (!%p295_p3), %s899_s19, 1  ;;  %p384_p6 = scmp.lt.s32.totalorder (!%p295_p3), %s895_s18, 3  ;;  %vm434_vm0 = vcmask (!%p295_p3), 64512   ;;  %v913_v0 = vmov (!%p295_p3), 0.0   ;;  %vm914_vm1 = vmmov (!%p295_p3), 0   ;;  %v915_v1 = vmov (!%p295_p3), 0  }
   0x9   : > { %s1042_s24 = smov (%p43_p4, %s1040_s24), 0  ;;  %298 = sbr.rel (%p295_p3) target bundleno = 830 (0x33e), region = 40 }
   0xa   : > { %809 = vmatprep.subr.bf16.mxu0 (!%p295_p3), %v913_v0  ;;  %435 = vst.msk [vmem:[#allocation4] sm:$0xff] (!%p295_p3), %vm434_vm0, %v913_v0  ;;  %811 = vmatprep.mubr.msk.bf16.mxu0 (!%p295_p3), %vm914_vm1, %v913_v0  ;;  %vm431_vm4 = vcmask (!%p295_p3), 7168   ;;  %v916_v9 = vmov (!%p295_p3), -inf   ;;  %v489_v10 = vlaneseq (!%p295_p3)  ;;  %vm551_vm10 = vcmask (!%p295_p3), 1043456  }
   0xb   : > { %865 = vset.pattern.permute.xlu0 (!%p295_p3), %v915_v1  ;;  %866 = vset.pattern.permute.xlu1 (!%p295_p3), %v915_v1  ;;  %432 = vst.msk [vmem:[#allocation2] sm:$0xff] (!%p295_p3), %vm431_vm4, %v916_v9  ;;  %433 = vst.msk [vmem:[#allocation3] sm:$0xff] (!%p295_p3), %vm431_vm4, %v913_v0  ;;  %vm611_vm11 = vcmask (!%p295_p3), 60416  }
   0xc   : > { %815 = vmatprep.subr.bf16.mxu1 (!%p295_p3), %v913_v0  ;;  %817 = vmatprep.mubr.msk.bf16.mxu1 (!%p295_p3), %vm914_vm1, %v913_v0  ;;  %v490_v11 = vshrl.u32 (!%p295_p3), %v489_v10, 7  ;;  %v495_v15 = vand.u32 (!%p295_p3), 127, %v489_v10 }
   0xe   : > { %v503_v12 = vsub.s32 (!%p295_p3), 0, %v490_v11  ;;  %vm512_vm8 = vcmp.le.s32.totalorder (!%p295_p3), %v495_v15, %v490_v11 }
  0x10   : > { %s1044_s19 = smov (!%p369_p5, %s899_s19), 1  ;;  %s1046_s18 = smov (!%p384_p6, %s895_s18), 3 }
  0x11   : > { %s793_s25 = sshll.u32 %s1044_s19, 2  ;;  %s792_s26 = sshll.u32 %s1044_s19, 3  ;;  %v539_v43 = vld [vmem:[#allocation4] sm:$0xff] }
  0x12   : > { %s390_s27 = sadd.s32 %s793_s25, %s1046_s18  ;;  %s375_s30 = scalar_lea.vmem %s1027_s0, %s792_s26  ;;  %v515_v23 = vld [vmem:[#allocation2] sm:$0xff]  ;;  %v531_v37 = vld [vmem:[#allocation3] sm:$0xff] }
  0x13   : > { %s981_s6 = sshll.u32 %s390_s27, 2  ;;  %v498_v2 = vld [vmem:[%s375_s30] sm:$0xff]  ;;  %s381_s9 = scalar_lea.vmem %s1028_s1, %s1044_s19 }
  0x14   : > { %s403_s12 = scalar_lea.vmem %s1030_s3, %s981_s6  ;;  %vm499_vm2 = vcmp.gt.f32.partialorder %v498_v2, 0.5  ;;  %v486_v3 = vld [vmem:[%s381_s9] sm:$0x1]  ;;  %s392_s15 = scalar_lea.vmem %s1029_s2, %s981_s6 }
  0x15   : > { %v437_v4 = vld [vmem:[%s403_s12] sm:$0xf]  ;;  %v506_v5 = vsel %vm499_vm2, 1, %v915_v1  ;;  %vm487_vm3 = vcmp.gt.f32.partialorder %v486_v3, 0.5  ;;  %s414_s18 = scalar_lea.vmem %s1031_s4, %s981_s6  ;;  %s425_s26 = scalar_lea.vmem %s1032_s5, %s981_s6 }
  0x16   : > { %v443_v6 = vsel %vm434_vm0, %v437_v4, 0  ;;  %508 = vperm.xlu0 %865, %v506_v5   ;;  %v500_v7 = vsel %vm487_vm3, 1, %v915_v1  ;;  %v436_v8 = vld [vmem:[%s392_s15] sm:$0xf] }
  0x17   : > { %810 = vmatpush3.bf16.xpose.msra.mxu0 %v443_v6  ;;  %v504_v13 = vrot.slane %v500_v7, %v503_v12  ;;  %v547_v28 = vld [vmem:[%s414_s18] sm:$0xf] }
  0x18   : > { %v553_v29 = vsel %vm551_vm10, %v547_v28, 0 }
  0x19   : > { %vm505_vm5 = vcmp.eq.s32.totalorder %v504_v13, 1  ;;  %816 = vmatpush3.bf16.msra.mxu1 %v553_v29 }
  0x1e   : > { %812 = vmatmul.mubr.msk.bf16.vlgmr.msra.gmra.mrb[0].mxu0 %vm434_vm0, %v436_v8 }
  0x95   : > { %v509_v14 = vpop.permute.xlu0 %508 }
  0x96   : > { %vm510_vm6 = vcmp.eq.s32.totalorder %v509_v14, 1 }
  0x97   : > { %vm511_vm7 = vmand %vm505_vm5, %vm510_vm6 }
  0x98   : > { %vm513_vm9 = vmand %vm511_vm7, %vm512_vm8 }
  0xf1   : > { %v479_v16 = vpop.f32.mrb[0].mxu0 }
  0xf2   : > { %v485_v17 = vmul.f32 0.35355338, %v479_v16  ;;  %v813_v18 = vpop.f32.mrb[1].mxu0 }
  0xf3   : > { %v482_v19 = vpop.f32.mrb[2].mxu0 }
  0xf4   : > { %v814_v20 = vpop.f32.mrb[3].mxu0  ;;  %v514_v21 = vsel %vm513_vm9, %v485_v17, -1e+09 }
  0xf5   : > { %v516_v22 = vsel %vm434_vm0, %v514_v21, -inf }
  0xf6   : > { %517 = vmax.xlane.f32.xlu0 %v516_v22 }
 0x183   : > { %v518_v24 = vpop.xlane.xlu0 %517 }
 0x184   : > { %v519_v25 = vmax.f32 %v515_v23, %v518_v24 }
 0x186   : > { %v520_v26 = vsub.f32 %v515_v23, %v519_v25  ;;  %597 = vst.msk [vmem:[#allocation2] sm:$0xff] %vm431_vm4, %v519_v25  ;;  %525 = vperm.xlu1 %866, %v519_v25  }
 0x188   : > { %v521_v27 = vmul.f32 1.442695, %v520_v26 }
 0x18a   : > { %867 = vpow2.f32 %v521_v27 }
 0x194   : > { %v868_v30 = vpop.eup %867 }
 0x195   : > { %542 = vperm.xlu0 %865, %v868_v30   ;;  %v532_v38 = vmul.f32 %v868_v30, %v531_v37 }
 0x205   : > { %v526_v31 = vpop.permute.xlu1 %525 }
 0x206   : > { %v528_v32 = vsub.f32 %v514_v21, %v526_v31 }
 0x208   : > { %v529_v33 = vmul.f32 1.442695, %v528_v32 }
 0x20a   : > { %869 = vpow2.f32 %v529_v33 }
 0x214   : > { %v870_v34 = vpop.eup %869  ;;  %v543_v44 = vpop.permute.xlu0 %542 }
 0x215   : > { %v533_v35 = vsel %vm434_vm0, %v870_v34, 0.0  ;;  %v546_v36 = vpack.c.bf16 %v870_v34, %v870_v34  ;;  %v545_v45 = vmul.f32 %v543_v44, %v539_v43 }
 0x216   : > { %534 = vadd.xlane.f32.xlu1 %v533_v35 }
 0x217   : > { %818 = vmatmul.mubr.msk.bf16.vlgmr.msra.gmra.mrb[0].mxu1 %vm434_vm0, %v546_v36 }
 0x2a3   : > { %v535_v39 = vpop.xlane.xlu1 %534 }
 0x2a4   : > { %v536_v40 = vadd.f32 %v535_v39, %v532_v38 }
 0x2a6   : > { %538 = vst.msk [vmem:[#allocation3] sm:$0xff] %vm431_vm4, %v536_v40 }
 0x2ad   : > { %v602_v41 = vld [vmem:[#allocation3] sm:$0xff] }
 0x2ae   : > { %871 = vrcp.f32 %v602_v41 }
 0x2b8   : > { %v872_v42 = vpop.eup %871 }
 0x2b9   : > { %606 = vperm.xlu1 %866, %v872_v42  }
 0x2ea   : > { %v589_v46 = vpop.f32.mrb[0].mxu1 }
 0x2eb   : > { %v595_v47 = vadd.f32 %v589_v46, %v545_v45  ;;  %v819_v48 = vpop.f32.mrb[1].mxu1 }
 0x2ec   : > { %v592_v49 = vpop.f32.mrb[2].mxu1 }
 0x2ed   : > { %596 = vst.msk [vmem:[#allocation4] sm:$0xff] %vm434_vm0, %v595_v47  ;;  %v820_v50 = vpop.f32.mrb[3].mxu1 }
 0x2f4   : > { %v601_v51 = vld [vmem:[#allocation4] sm:$0xff] }
 0x338   : > { %v607_v52 = vpop.permute.xlu1 %606 }
 0x339   : > { %v609_v53 = vmul.f32 %v607_v52, %v601_v51 }
 0x33b   : > { %v610_v54 = vpack.c.bf16 %v609_v53, %v609_v53 }
 0x33d   : > { %612 = vst.msk [vmem:[%s425_s26] sm:$0xf] %vm611_vm11, %v610_v54 }
 0x33e PF: > { %s15_s22 = sadd.s32 1, %s911_s22   ;;  %s1033_s18 = smov %s903_s20 }
 0x33f   : > { %p12_p7 = scmp.ge.s32.totalorder %s15_s22, 10   ;;  %s1034_s19 = smov %s907_s21 }
 0x340   : > { %s1035_s20 = smov %s1038_s23  ;;  %s1036_s21 = smov %s1042_s24 }
 0x341   :  { %14 = sbr.rel (!%p12_p7) target bundleno = 3 (0x3), region = 90 }

// kernel: transformer_forward.37
= control target key start
LH: loop header
LB: loop body
LE: loop exit
PB: predicated region body
PF: predicated region fallthrough
CT: control target
= control target key end

     0   :  { %vm19_vm0 = vcmask 523264   ;;  %v145_v0 = vmov 0.0   ;;  %vm146_vm1 = vmmov 0   ;;  %vm43_vm2 = vcmask 261120   ;;  %s192_s1 = inlined_call_operand.vmem [shape: bf16[32,64], index: 1, kind: input, shape index: {}]   ;;  %s193_s0 = inlined_call_operand.vmem [shape: f32[16,32], index: 0, kind: input, shape index: {}]   ;;  %s194_s2 = inlined_call_operand.vmem [shape: f32[1,64], index: 2, kind: input, shape index: {}]   ;;  %s195_s3 = inlined_call_operand.vmem [shape: bf16[16,64], index: 3, kind: output, shape index: {}]  }
   0x1   :  { %133 = vmatprep.subr.bf16.mxu0 %v145_v0  ;;  %v143_v1 = vld [vmem:[%s192_s1] sm:$0xff]   ;;  %137 = vmatprep.mubr.msk.bf16.mxu0 %vm146_vm1, %v145_v0  ;;  %20 = vst.msk [vmem:[#allocation2] sm:$0xff] %vm19_vm0, %v145_v0  ;;  %21 = vst.msk [vmem:[#allocation2 + $0x8] sm:$0xff] %vm19_vm0, %v145_v0  ;;  %v144_v2 = vld [vmem:[%s192_s1 + $0x8] sm:$0xff]   ;;  %vm115_vm3 = vcmask 519168  }
   0x2   :  { %134 = vmatpush3.bf16.msra.mxu0 %v143_v1  ;;  %v24_v3 = vld [vmem:[%s193_s0] sm:$0xff]  ;;  %v25_v4 = vld [vmem:[%s193_s0 + $0x8] sm:$0xff] }
   0x3   :  { %135 = vmatprep.subr.bf16.mxu0 %v145_v0  ;;  %v26_v5 = vpack.c.bf16 %v25_v4, %v24_v3  ;;  %v125_v14 = vld [vmem:[%s194_s2] ss:$0 sm:$0xff] }
   0x6   :  { %136 = vmatpush3.bf16.msra.mxu0 %v144_v2 }
   0x8   :  { %v22_v6 = vld [vmem:[#allocation2] sm:$0xff]  ;;  %v23_v8 = vld [vmem:[#allocation2 + $0x8] sm:$0xff] }
   0x9   :  { %138 = vmatmul.mubr.msk.bf16.vlgmr.msra.gmra.mrb[0].mxu0 %vm43_vm2, %v26_v5 }
  0xdc   :  { %v81_v7 = vpop.f32.mrb[0].mxu0 }
  0xdd   :  { %v88_v9 = vadd.f32 %v81_v7, %v22_v6  ;;  %v139_v10 = vpop.f32.mrb[1].mxu0 }
  0xde   :  { %v84_v11 = vpop.f32.mrb[2].mxu0 }
  0xdf   :  { %91 = vst.msk [vmem:[#allocation2] sm:$0xff] %vm19_vm0, %v88_v9  ;;  %v89_v12 = vadd.f32 %v84_v11, %v23_v8  ;;  %v140_v13 = vpop.f32.mrb[3].mxu0 }
  0xe1   :  { %92 = vst.msk [vmem:[#allocation2 + $0x8] sm:$0xff] %vm19_vm0, %v89_v12 }
  0xe6   :  { %v96_v15 = vld [vmem:[#allocation2] sm:$0xff] }
  0xe7   :  { %v105_v16 = vadd.f32 %v125_v14, %v96_v15 }
  0xe8   :  { %v97_v17 = vld [vmem:[#allocation2 + $0x8] sm:$0xff] }
  0xe9   :  { %v128_v18 = vpack.c.bf16 %v105_v16, %v105_v16  ;;  %v106_v19 = vadd.f32 %v125_v14, %v97_v17 }
  0xeb   :  { %116 = vst.msk [vmem:[%s195_s3] sm:$0xf] %vm115_vm3, %v128_v18  ;;  %v129_v20 = vpack.c.bf16 %v106_v19, %v106_v19 }
  0xed   :  { %117 = vst.msk [vmem:[%s195_s3 + $0x4] sm:$0xf] %vm115_vm3, %v129_v20 }

// kernel: transformer_forward.26
= control target key start
LH: loop header
LB: loop body
LE: loop exit
PB: predicated region body
PF: predicated region fallthrough
CT: control target
= control target key end

     0   :  { %s926_s18 = smov 0   ;;  %s928_s19 = smov 0   ;;  %s1003_s0 = inlined_call_operand.vmem [shape: f32[2,8,1], index: 0, kind: input, shape index: {}]   ;;  %s1004_s1 = inlined_call_operand.vmem [shape: f32[2,1,8], index: 1, kind: input, shape index: {}]   ;;  %s1005_s2 = inlined_call_operand.vmem [shape: bf16[2,4,8,8], index: 2, kind: input, shape index: {}]   ;;  %s1006_s3 = inlined_call_operand.vmem [shape: bf16[2,4,8,8], index: 3, kind: input, shape index: {}]   ;;  %s1007_s4 = inlined_call_operand.vmem [shape: bf16[2,4,8,8], index: 4, kind: input, shape index: {}]   ;;  %s1008_s5 = inlined_call_operand.vmem [shape: bf16[2,4,8,8], index: 5, kind: output, shape index: {}]  }
   0x1   :  { %s930_s0 = smov 0   ;;  %s932_s20 = smov 0  }
   0x2   :  { %s934_s21 = smov 0  }
   0x3 LB: > { %s37_s22 = sadd.s32 1, %s882_s0  ;;  %s41_s23 = sadd.s32 1, %s886_s20  ;;  %s890_s21 = sphi %s934_s21, %s15_s21   ;;  %s886_s20 = sphi %s932_s20, %s1012_s20   ;;  %s882_s0 = sphi %s930_s0, %s1011_s0   ;;  %s878_s19 = sphi %s928_s19, %s1010_s19   ;;  %s874_s18 = sphi %s926_s18, %s1009_s18  }
   0x4   : > { %p39_p0 = scmp.ge.s32.totalorder %s37_s22, 4  ;;  %p771_p1 = scmp.ge.s32.totalorder %s890_s21, 1 }
   0x5   : > { %p294_p2 = scmp.lt.s32.totalorder %s890_s21, 9 }
   0x6   : > { %s1014_s22 = smov (%p39_p0, %s37_s22), 0  ;;  %s1016_s23 = smov (!%p39_p0, %s41_s23), %s886_s20 }
   0x7   : > { %p295_p3 = pnand %p771_p1, %p294_p2  ;;  %p43_p4 = scmp.ge.s32.totalorder %s1016_s23, 2 }
   0x8   : > { %p376_p5 = scmp.lt.s32.totalorder (!%p295_p3), %s878_s19, 1  ;;  %p384_p6 = scmp.lt.s32.totalorder (!%p295_p3), %s874_s18, 3  ;;  %vm434_vm0 = vcmask (!%p295_p3), 64512   ;;  %v892_v0 = vmov (!%p295_p3), 0.0   ;;  %vm893_vm1 = vmmov (!%p295_p3), 0   ;;  %v894_v4 = vmov (!%p295_p3), 0  }
   0x9   : > { %s1018_s23 = smov (%p43_p4, %s1016_s23), 0  ;;  %298 = sbr.rel (%p295_p3) target bundleno = 830 (0x33e), region = 40 }
   0xa   : > { %788 = vmatprep.subr.bf16.mxu0 (!%p295_p3), %v892_v0  ;;  %435 = vst.msk [vmem:[#allocation4] sm:$0xff] (!%p295_p3), %vm434_vm0, %v892_v0  ;;  %790 = vmatprep.mubr.msk.bf16.mxu0 (!%p295_p3), %vm893_vm1, %v892_v0  ;;  %vm431_vm2 = vcmask (!%p295_p3), 7168   ;;  %v895_v5 = vmov (!%p295_p3), -inf   ;;  %v489_v6 = vlaneseq (!%p295_p3)  ;;  %vm531_vm5 = vcmask (!%p295_p3), 1043456  }
   0xb   : > { %794 = vmatprep.subr.bf16.mxu1 (!%p295_p3), %v892_v0  ;;  %796 = vmatprep.mubr.msk.bf16.mxu1 (!%p295_p3), %vm893_vm1, %v892_v0  ;;  %432 = vst.msk [vmem:[#allocation2] sm:$0xff] (!%p295_p3), %vm431_vm2, %v895_v5  ;;  %433 = vst.msk [vmem:[#allocation3] sm:$0xff] (!%p295_p3), %vm431_vm2, %v892_v0  ;;  %vm591_vm6 = vcmask (!%p295_p3), 60416  }
   0xc   : > { %844 = vset.pattern.permute.xlu0 (!%p295_p3), %v894_v4  ;;  %845 = vset.pattern.permute.xlu1 (!%p295_p3), %v894_v4  ;;  %v490_v8 = vshrl.u32 (!%p295_p3), %v489_v6, 7 }
   0xe   : > { %v491_v9 = vsub.s32 (!%p295_p3), 0, %v490_v8 }
  0x10   : > { %s1020_s19 = smov (!%p376_p5, %s878_s19), 1  ;;  %s1022_s18 = smov (!%p384_p6, %s874_s18), 3 }
  0x11   : > { %s772_s24 = sshll.u32 %s1020_s19, 2  ;;  %s381_s10 = scalar_lea.vmem %s1004_s1, %s1020_s19  ;;  %v519_v39 = vld [vmem:[#allocation4] sm:$0xff] }
  0x12   : > { %s390_s25 = sadd.s32 %s772_s24, %s1022_s18  ;;  %v486_v7 = vld [vmem:[%s381_s10] sm:$0x1]  ;;  %v511_v33 = vld [vmem:[#allocation3] sm:$0xff] }
  0x13   : > { %s957_s26 = sshll.u32 %s390_s25, 2  ;;  %vm487_vm3 = vcmp.gt.f32.partialorder %v486_v7, 0.5  ;;  %v495_v19 = vld [vmem:[#allocation2] sm:$0xff] }
  0x14   : > { %s403_s29 = scalar_lea.vmem %s1006_s3, %s957_s26  ;;  %s392_s7 = scalar_lea.vmem %s1005_s2, %s957_s26  ;;  %v488_v10 = vsel %vm487_vm3, 1, %v894_v4 }
  0x15   : > { %v437_v1 = vld [vmem:[%s403_s29] sm:$0xf]  ;;  %v492_v11 = vrot.slane %v488_v10, %v491_v9  ;;  %s414_s13 = scalar_lea.vmem %s1007_s4, %s957_s26  ;;  %s425_s16 = scalar_lea.vmem %s1008_s5, %s957_s26 }
  0x16   : > { %v443_v2 = vsel %vm434_vm0, %v437_v1, 0  ;;  %v436_v3 = vld [vmem:[%s392_s7] sm:$0xf] }
  0x17   : > { %789 = vmatpush3.bf16.xpose.msra.mxu0 %v443_v2  ;;  %vm493_vm4 = vcmp.eq.s32.totalorder %v492_v11, 1  ;;  %v527_v23 = vld [vmem:[%s414_s13] sm:$0xf] }
  0x18   : > { %v533_v24 = vsel %vm531_vm5, %v527_v23, 0 }
  0x19   : > { %795 = vmatpush3.bf16.msra.mxu1 %v533_v24 }
  0x1e   : > { %791 = vmatmul.mubr.msk.bf16.vlgmr.msra.gmra.mrb[0].mxu0 %vm434_vm0, %v436_v3 }
  0xf1   : > { %v479_v12 = vpop.f32.mrb[0].mxu0 }
  0xf2   : > { %v485_v13 = vmul.f32 0.35355338, %v479_v12  ;;  %v792_v14 = vpop.f32.mrb[1].mxu0 }
  0xf3   : > { %v482_v15 = vpop.f32.mrb[2].mxu0 }
  0xf4   : > { %v793_v16 = vpop.f32.mrb[3].mxu0  ;;  %v494_v17 = vsel %vm493_vm4, %v485_v13, -1e+09 }
  0xf5   : > { %v496_v18 = vsel %vm434_vm0, %v494_v17, -inf }
  0xf6   : > { %497 = vmax.xlane.f32.xlu0 %v496_v18 }
 0x183   : > { %v498_v20 = vpop.xlane.xlu0 %497 }
 0x184   : > { %v499_v21 = vmax.f32 %v495_v19, %v498_v20 }
 0x186   : > { %v500_v22 = vsub.f32 %v495_v19, %v499_v21  ;;  %577 = vst.msk [vmem:[#allocation2] sm:$0xff] %vm431_vm2, %v499_v21  ;;  %505 = vperm.xlu0 %844, %v499_v21  }
 0x188   : > { %v501_v31 = vmul.f32 1.442695, %v500_v22 }
 0x205   : > { %v506_v25 = vpop.permute.xlu0 %505 }
 0x206   : > { %v508_v26 = vsub.f32 %v494_v17, %v506_v25 }
 0x208   : > { %v509_v27 = vmul.f32 1.442695, %v508_v26 }
 0x20a   : > { %846 = vpow2.f32 %v509_v27 }
 0x20b   : > { %848 = vpow2.f32 %v501_v31 }
 0x214   : > { %v847_v28 = vpop.eup %846 }
 0x215   : > { %v513_v29 = vsel %vm434_vm0, %v847_v28, 0.0  ;;  %v526_v30 = vpack.c.bf16 %v847_v28, %v847_v28  ;;  %v849_v32 = vpop.eup %848 }
 0x216   : > { %514 = vadd.xlane.f32.xlu1 %v513_v29  ;;  %v512_v34 = vmul.f32 %v849_v32, %v511_v33 }
 0x217   : > { %797 = vmatmul.mubr.msk.bf16.vlgmr.msra.gmra.mrb[0].mxu1 %vm434_vm0, %v526_v30 }
 0x227   : > { %522 = vperm.xlu1 %845, %v849_v32  }
 0x2a3   : > { %v515_v35 = vpop.xlane.xlu1 %514 }
 0x2a4   : > { %v516_v36 = vadd.f32 %v515_v35, %v512_v34 }
 0x2a6   : > { %518 = vst.msk [vmem:[#allocation3] sm:$0xff] %vm431_vm2, %v516_v36 }
 0x2a7   : > { %v523_v40 = vpop.permute.xlu1 %522 }
 0x2a8   : > { %v525_v41 = vmul.f32 %v523_v40, %v519_v39 }
 0x2ad   : > { %v582_v37 = vld [vmem:[#allocation3] sm:$0xff] }
 0x2ae   : > { %850 = vrcp.f32 %v582_v37 }
 0x2b8   : > { %v851_v38 = vpop.eup %850 }
 0x2b9   : > { %586 = vperm.xlu1 %845, %v851_v38  }
 0x2ea   : > { %v569_v42 = vpop.f32.mrb[0].mxu1 }
 0x2eb   : > { %v575_v43 = vadd.f32 %v569_v42, %v525_v41  ;;  %v798_v44 = vpop.f32.mrb[1].mxu1 }
 0x2ec   : > { %v572_v45 = vpop.f32.mrb[2].mxu1 }
 0x2ed   : > { %576 = vst.msk [vmem:[#allocation4] sm:$0xff] %vm434_vm0, %v575_v43  ;;  %v799_v46 = vpop.f32.mrb[3].mxu1 }
 0x2f4   : > { %v581_v47 = vld [vmem:[#allocation4] sm:$0xff] }
 0x338   : > { %v587_v48 = vpop.permute.xlu1 %586 }
 0x339   : > { %v589_v49 = vmul.f32 %v587_v48, %v581_v47 }
 0x33b   : > { %v590_v50 = vpack.c.bf16 %v589_v49, %v589_v49 }
 0x33d   : > { %592 = vst.msk [vmem:[%s425_s16] sm:$0xf] %vm591_vm6, %v590_v50 }
 0x33e PF: > { %s15_s21 = sadd.s32 1, %s890_s21   ;;  %s1009_s18 = smov %s882_s0 }
 0x33f   : > { %p12_p7 = scmp.ge.s32.totalorder %s15_s21, 10   ;;  %s1010_s19 = smov %s886_s20 }
 0x340   : > { %s1011_s0 = smov %s1014_s22  ;;  %s1012_s20 = smov %s1018_s23 }
 0x341   :  { %14 = sbr.rel (!%p12_p7) target bundleno = 3 (0x3), region = 90 }

// kernel: transformer_forward.28
= control target key start
LH: loop header
LB: loop body
LE: loop exit
PB: predicated region body
PF: predicated region fallthrough
CT: control target
= control target key end

     0   :  { %vm31_vm0 = vcmask 261120   ;;  %v312_v0 = vmov 0.0   ;;  %vm313_vm1 = vmmov 0   ;;  %vm142_vm2 = vcmask 523264   ;;  %s407_s1 = inlined_call_operand.vmem [shape: bf16[32,64], index: 1, kind: input, shape index: {}]   ;;  %s408_s0 = inlined_call_operand.vmem [shape: f32[16,32], index: 0, kind: input, shape index: {}]   ;;  %s409_s3 = inlined_call_operand.vmem [shape: bf16[64,32], index: 3, kind: input, shape index: {}]   ;;  %s410_s2 = inlined_call_operand.vmem [shape: f32[1,64], index: 2, kind: input, shape index: {}]   ;;  %s411_s4 = inlined_call_operand.vmem [shape: f32[1,32], index: 4, kind: input, shape index: {}]   ;;  %s412_s5 = inlined_call_operand.vmem [shape: f32[1,32], index: 5, kind: input, shape index: {}]   ;;  %s413_s6 = inlined_call_operand.vmem [shape: f32[1,32], index: 6, kind: input, shape index: {}]   ;;  %s414_s7 = inlined_call_operand.vmem [shape: f32[16,32], index: 7, kind: output, shape index: {}]  }
   0x1   :  { %280 = vmatprep.subr.bf16.mxu0 %v312_v0  ;;  %v302_v1 = vld [vmem:[%s407_s1] sm:$0xff]   ;;  %284 = vmatprep.mubr.msk.bf16.mxu0 %vm313_vm1, %v312_v0  ;;  %32 = vst.msk [vmem:[#allocation2] sm:$0xff] %vm31_vm0, %v312_v0  ;;  %33 = vst.msk [vmem:[#allocation2 + $0x8] sm:$0xff] %vm31_vm0, %v312_v0  ;;  %v303_v2 = vld [vmem:[%s407_s1 + $0x8] sm:$0xff]  }
   0x2   :  { %288 = vmatprep.subr.bf16.mxu1 %v312_v0  ;;  %296 = vmatprep.mubr.msk.bf16.mxu1 %vm313_vm1, %v312_v0  ;;  %v34_v3 = vld [vmem:[%s408_s0] sm:$0xff]  ;;  %v35_v4 = vld [vmem:[%s408_s0 + $0x8] sm:$0xff]  ;;  %v306_v8 = vld [vmem:[%s409_s3 + $0x10] sm:$0xff]  }
   0x3   :  { %281 = vmatpush3.bf16.msra.mxu0 %v302_v1  ;;  %v304_v5 = vld [vmem:[%s409_s3] sm:$0xff]   ;;  %v305_v6 = vld [vmem:[%s409_s3 + $0x8] sm:$0xff]   ;;  %v36_v7 = vpack.c.bf16 %v35_v4, %v34_v3  ;;  %v307_v9 = vld [vmem:[%s409_s3 + $0x18] sm:$0xff]  }
   0x4   :  { %282 = vmatprep.subr.bf16.mxu0 %v312_v0  ;;  %289 = vmatpush3.bf16.msra.mxu1 %v304_v5  ;;  %v260_v10 = vld [vmem:[%s410_s2] ss:$0 sm:$0xff] }
   0x5   :  { %290 = vmatprep.subr.bf16.mxu1 %v312_v0  ;;  %v269_v28 = vld [vmem:[%s411_s4] ss:$0 sm:$0xff] }
   0x6   :  { %v270_v54 = vld [vmem:[%s412_s5] ss:$0 sm:$0xff] }
   0x7   :  { %283 = vmatpush3.bf16.msra.mxu0 %v303_v2  ;;  %v271_v56 = vld [vmem:[%s413_s6] ss:$0 sm:$0xff] }
   0x8   :  { %291 = vmatpush3.bf16.msra.mxu1 %v305_v6  ;;  %v107_v20 = vld [vmem:[#allocation2] sm:$0xff]  ;;  %v108_v22 = vld [vmem:[#allocation2 + $0x8] sm:$0xff] }
   0x9   :  { %292 = vmatprep.subr.bf16.mxu1 %v312_v0 }
   0xa   :  { %285 = vmatmul.mubr.msk.bf16.vlgmr.msra.gmra.mrb[0].mxu0 %vm31_vm0, %v36_v7 }
   0xc   :  { %293 = vmatpush3.bf16.msra.mxu1 %v306_v8 }
   0xd   :  { %294 = vmatprep.subr.bf16.mxu1 %v312_v0 }
  0x10   :  { %295 = vmatpush3.bf16.msra.mxu1 %v307_v9 }
  0xdd   :  { %v98_v11 = vpop.f32.mrb[0].mxu0 }
  0xde   :  { %v99_v12 = vadd.f32 %v260_v10, %v98_v11  ;;  %v286_v13 = vpop.f32.mrb[1].mxu0 }
  0xdf   :  { %v101_v14 = vpop.f32.mrb[2].mxu0 }
  0xe0   :  { %v102_v15 = vadd.f32 %v260_v10, %v101_v14  ;;  %v287_v16 = vpop.f32.mrb[3].mxu0  ;;  %v105_v17 = vmax.f32 %v99_v12, 0.0 }
  0xe2   :  { %v106_v18 = vmax.f32 %v102_v15, 0.0 }
  0xe4   :  { %v109_v19 = vpack.c.bf16 %v106_v18, %v105_v17 }
  0xe6   :  { %297 = vmatmul.mubr.msk.bf16.vlgmr.msra.gmra.mrb[0].mxu1 %vm142_vm2, %v109_v19 }
 0x1b9   :  { %v180_v21 = vpop.f32.mrb[0].mxu1 }
 0x1ba   :  { %v187_v23 = vadd.f32 %v180_v21, %v107_v20  ;;  %v298_v24 = vpop.f32.mrb[1].mxu1 }
 0x1bb   :  { %v183_v25 = vpop.f32.mrb[2].mxu1 }
 0x1bc   :  { %189 = vst.msk [vmem:[#allocation2] sm:$0xff] %vm31_vm0, %v187_v23  ;;  %v188_v26 = vadd.f32 %v183_v25, %v108_v22  ;;  %v299_v27 = vpop.f32.mrb[3].mxu1 }
 0x1be   :  { %190 = vst.msk [vmem:[#allocation2 + $0x8] sm:$0xff] %vm31_vm0, %v188_v26 }
 0x1c3   :  { %v194_v29 = vld [vmem:[#allocation2] sm:$0xff] }
 0x1c4   :  { %v203_v30 = vadd.f32 %v269_v28, %v194_v29 }
 0x1c5   :  { %v195_v31 = vld [vmem:[#allocation2 + $0x8] sm:$0xff] }
 0x1c6   :  { %v207_v32 = vadd.f32 %v203_v30, %v34_v3  ;;  %v204_v33 = vadd.f32 %v269_v28, %v195_v31 }
 0x1c8   :  { %v209_v34 = vsel %vm31_vm0, %v207_v32, 0.0  ;;  %v208_v35 = vadd.f32 %v204_v33, %v35_v4 }
 0x1c9   :  { %210 = vadd.xlane.f32.xlu0 %v209_v34 }
 0x1ca   :  { %v212_v36 = vsel %vm31_vm0, %v208_v35, 0.0 }
 0x1cd   :  { %213 = vadd.xlane.f32.xlu0 %v212_v36 }
 0x256   :  { %v211_v37 = vpop.xlane.xlu0 %210 }
 0x257   :  { %v216_v38 = vmul.f32 0.03125, %v211_v37 }
 0x259   :  { %v218_v39 = vsub.f32 %v207_v32, %v216_v38 }
 0x25a   :  { %v214_v40 = vpop.xlane.xlu0 %213 }
 0x25b   :  { %v217_v41 = vmul.f32 0.03125, %v214_v40  ;;  %v220_v42 = vmul.f32 %v218_v39, %v218_v39 }
 0x25d   :  { %v219_v43 = vsub.f32 %v208_v35, %v217_v41  ;;  %v222_v44 = vsel %vm31_vm0, %v220_v42, 0.0 }
 0x25e   :  { %223 = vadd.xlane.f32.xlu1 %v222_v44 }
 0x25f   :  { %v221_v45 = vmul.f32 %v219_v43, %v219_v43 }
 0x261   :  { %v225_v46 = vsel %vm31_vm0, %v221_v45, 0.0 }
 0x262   :  { %226 = vadd.xlane.f32.xlu1 %v225_v46 }
 0x2eb   :  { %v224_v47 = vpop.xlane.xlu1 %223 }
 0x2ec   :  { %v228_v48 = vmul.f32 0.03125, %v224_v47 }
 0x2ee   :  { %v230_v49 = vadd.f32 1e-05, %v228_v48 }
 0x2ef   :  { %v227_v50 = vpop.xlane.xlu1 %226 }
 0x2f0   :  { %308 = vrsqrt.f32 %v230_v49  ;;  %v229_v51 = vmul.f32 0.03125, %v227_v50 }
 0x2f2   :  { %v231_v52 = vadd.f32 1e-05, %v229_v51 }
 0x2f4   :  { %310 = vrsqrt.f32 %v231_v52 }
 0x2fa   :  { %v309_v53 = vpop.eup %308 }
 0x2fb   :  { %v234_v55 = vmul.f32 %v309_v53, %v218_v39 }
 0x2fd   :  { %v243_v57 = vmul.f32 %v270_v54, %v234_v55 }
 0x2fe   :  { %v311_v58 = vpop.eup %310 }
 0x2ff   :  { %v252_v59 = vadd.f32 %v271_v56, %v243_v57  ;;  %v235_v60 = vmul.f32 %v311_v58, %v219_v43 }
 0x301   :  { %254 = vst.msk [vmem:[%s414_s7] sm:$0xff] %vm31_vm0, %v252_v59  ;;  %v244_v61 = vmul.f32 %v270_v54, %v235_v60 }
 0x303   :  { %v253_v62 = vadd.f32 %v271_v56, %v244_v61 }
 0x305   :  { %255 = vst.msk [vmem:[%s414_s7 + $0x8] sm:$0xff] %vm31_vm0, %v253_v62 }

// kernel: transformer_forward.49
= control target key start
LH: loop header
LB: loop body
LE: loop exit
PB: predicated region body
PF: predicated region fallthrough
CT: control target
= control target key end

     0   :  { %v172_v1 = vmov 0.0   ;;  %vm173_vm0 = vmmov 0   ;;  %vm20_vm1 = vcmask 195584   ;;  %s230_s0 = inlined_call_operand.vmem [shape: f32[16,32], index: 0, kind: input, shape index: {}]   ;;  %s231_s1 = inlined_call_operand.vmem [shape: bf16[32,24], index: 1, kind: input, shape index: {}]   ;;  %s232_s2 = inlined_call_operand.vmem [shape: f32[1,24], index: 2, kind: input, shape index: {}]   ;;  %s233_s3 = inlined_call_operand.hbm [shape: f32[16,24], index: 3, kind: output, shape index: {}]  }
   0x1   :  { %v146_v0 = vld [vmem:[%s231_s1] sm:$0xff]   ;;  %133 = vmatprep.subr.bf16.mxu0 %v172_v1  ;;  %v147_v2 = vld [vmem:[%s231_s1 + $0x8] sm:$0xff]   ;;  %137 = vmatprep.mubr.msk.bf16.mxu0 %vm173_vm0, %v172_v1 }
   0x2   :  { %134 = vmatpush3.bf16.msra.mxu0 %v146_v0  ;;  %v25_v3 = vld [vmem:[%s230_s0] sm:$0xff]  ;;  %v26_v4 = vld [vmem:[%s230_s0 + $0x8] sm:$0xff] }
   0x3   :  { %8 = vsyncpa [#allocation4], 0  ;;  %135 = vmatprep.subr.bf16.mxu0 %v172_v1  ;;  %21 = vst.msk [vmem:[#allocation2] sm:$0xff] %vm20_vm1, %v172_v1  ;;  %v27_v5 = vpack.c.bf16 %v26_v4, %v25_v3  ;;  %vm44_vm2 = vcmask 261120   ;;  %v129_v14 = vld [vmem:[%s232_s2] ss:$0 sm:$0xff] }
   0x4   :  { %22 = vst.msk [vmem:[#allocation2 + $0x8] sm:$0xff] %vm20_vm1, %v172_v1  ;;  %s174_s20 = smov [#allocation3]  }
   0x5   :  { %s115_s21 = sshll.u32 %s174_s20, 4  ;;  %s116_s21 = int_to_ptr.vmem [resolvable:$true] %s115_s21 }
   0x6   :  { %136 = vmatpush3.bf16.msra.mxu0 %v147_v2  ;;  %s148_s22 = scalar_lea.vmem %s116_s21, 256  ;;  %p153_p1 = scmp.lt.s32.totalorder %s116_s21, %s116_s21 }
   0x7   :  { %p149_p0 = scmp.ne.s32.totalorder %s116_s21, %s148_s22  ;;  %p154_p2 = scmp.lt.s32.totalorder %s148_s22, %s148_s22 }
   0x9   :  { %138 = vmatmul.mubr.msk.bf16.vlgmr.msra.gmra.mrb[0].mxu0 %vm44_vm2, %v27_v5  ;;  %p155_p3 = por %p154_p2, %p153_p1 }
   0xa   :  { %v23_v6 = vld [vmem:[#allocation2] sm:$0xff] }
   0xb   :  { %v24_v8 = vld [vmem:[#allocation2 + $0x8] sm:$0xff]  ;;  %p156_p4 = pnand %p155_p3, %p149_p0 }
  0xdc   :  { %v82_v7 = vpop.f32.mrb[0].mxu0 }
  0xdd   :  { %v89_v9 = vadd.f32 %v82_v7, %v23_v6  ;;  %v139_v10 = vpop.f32.mrb[1].mxu0 }
  0xde   :  { %v85_v11 = vpop.f32.mrb[2].mxu0 }
  0xdf   :  { %92 = vst.msk [vmem:[#allocation2] sm:$0xff] %vm20_vm1, %v89_v9  ;;  %v90_v12 = vadd.f32 %v85_v11, %v24_v8  ;;  %v140_v13 = vpop.f32.mrb[3].mxu0 }
  0xe1   :  { %93 = vst.msk [vmem:[#allocation2 + $0x8] sm:$0xff] %vm20_vm1, %v90_v12 }
  0xe6   :  { %v97_v15 = vld [vmem:[#allocation2] sm:$0xff] }
  0xe7   :  { %v106_v16 = vadd.f32 %v129_v14, %v97_v15 }
  0xe8   :  { %v98_v17 = vld [vmem:[#allocation2 + $0x8] sm:$0xff] }
  0xe9   :  { %v107_v18 = vadd.f32 %v129_v14, %v98_v17  ;;  %108 = vst.msk [vmem:[#allocation3] sm:$0xff] %vm20_vm1, %v106_v16 }
  0xeb   :  { %109 = vst.msk [vmem:[#allocation3 + $0x8] sm:$0xff] %vm20_vm1, %v107_v18 }
  0xec   :  { %159 = shalt.err (!%p156_p4)
}
  0xed   :  { %s160_s24 = scalar_lea.hbm %s233_s3, 256 }
  0xee   :  { %p161_p5 = scmp.ne.s32.totalorder %s233_s3, %s160_s24  ;;  %p164_p6 = scmp.lt.u32.totalorder %s160_s24, %s233_s3 }
  0xf0   :  { %p166_p7 = pnand %p164_p6, %p161_p5 }
  0xf2   :  { %169 = shalt.err (!%p166_p7)
}
  0xf3   :  { %s175_s29 = smov 128   ;;  %s176_s30 = smov 8  }
  0xf4   :  { %121 = dma.vmem_to_hbm [thread:$0]  %s116_s21, 256, %s233_s3, [#allocation4], %s175_s29, %s175_s29, %s176_s30  }
  0xf5   :  { %170 = dma.done.wait [#allocation4], 256  }
  0xf6   :  { %171 = vsyncadd [#allocation4], 4294967040 }
  0xf7   :  { %125 = vsyncpa [#allocation4], 1 }

</bundles_post_ra>
